<compile_context>
chip_gen: v5e
topology: v5e:2x2
jax: 0.10.0
libtpu: 0.0.40
codegen_flags: <defaults>
</compile_context>

<pallas_src>
import functools

import jax
import jax.numpy as jnp
from jax.experimental import pallas as pl
from jax.experimental.pallas import tpu as pltpu  # noqa: F401  (TPU backend)


# ----------------------------------------------------------------------------
# Fused kernel: batched GCN (2 layers) + mean pool + 2-layer LSTM + Linear
# ----------------------------------------------------------------------------
def tgcn_fused_kernel(a_bd_ref, x_ref, gcnw_ref, lstmw_ref, bias_ref,
                      out_ref, *, T, N, F_pad, GH, LH):
    TN = T * N
    a = a_bd_ref[...]                              # (T*N, T*N)
    x = x_ref[...]                                 # (T*N, F_pad)

    gw = gcnw_ref[...]                             # (F_pad+GH, GH)
    w1 = gw[:F_pad, :]                             # (F_pad, GH)
    w2 = gw[F_pad:F_pad + GH, :]                   # (GH, GH)

    bias = bias_ref[...]                           # (5, 4*LH)
    b1 = bias[0:1, :GH]
    b2 = bias[1:2, :GH]
    bg0 = bias[2:3, :]
    bg1 = bias[3:4, :]
    blin = bias[4:5, :]

    # ---- GCN layer 1: A_hat @ (X @ W1) + b1, ReLU (batched over timesteps)
    h = jnp.dot(x, w1, preferred_element_type=jnp.float32)
    h = jnp.dot(a, h, preferred_element_type=jnp.float32) + b1
    h = jnp.maximum(h, 0.0)
    # ---- GCN layer 2
    h = jnp.dot(h, w2, preferred_element_type=jnp.float32)
    h = jnp.dot(a, h, preferred_element_type=jnp.float32) + b2
    h = jnp.maximum(h, 0.0)                        # (T*N, GH)

    # ---- global mean pool per timestep as an MXU matmul: (T, T*N) @ (T*N, GH)
    row = jax.lax.broadcasted_iota(jnp.int32, (T, TN), 0)
    col = jax.lax.broadcasted_iota(jnp.int32, (T, TN), 1)
    lo = row * N
    pool = jnp.where((col >= lo) & (col < lo + N),
                     jnp.float32(1.0 / N), jnp.float32(0.0))
    seq = jnp.dot(pool, h, preferred_element_type=jnp.float32)       # (T, GH)

    # ---- unpack the LSTM/Linear weight slab (all static row slices)
    lw = lstmw_ref[...]                            # (GH+4*LH, 4*LH)
    wih0 = lw[:GH, :]                              # (GH, 4*LH)
    whh0 = lw[GH:GH + LH, :]                       # (LH, 4*LH)
    wih1 = lw[GH + LH:GH + 2 * LH, :]              # (LH, 4*LH)
    whh1 = lw[GH + 2 * LH:GH + 3 * LH, :]          # (LH, 4*LH)
    wlin = lw[GH + 3 * LH:GH + 4 * LH, :]          # (LH, 4*LH) zero-padded cols

    # ---- 2-layer LSTM (batch = 1), PyTorch gate order (i, f, g, o)
    def gates_to_hc(g, c):
        # One sigmoid over the whole 4*LH gate vector (3 EUP pushes per cell).
        sg = jax.nn.sigmoid(g)
        i = sg[:, 0 * LH:1 * LH]
        f = sg[:, 1 * LH:2 * LH]
        o = sg[:, 3 * LH:4 * LH]
        gg = jnp.tanh(g[:, 2 * LH:3 * LH])
        c_new = f * c + i * gg
        return o * jnp.tanh(c_new), c_new

    # Hoisted layer-0 input projection for all timesteps: (T, 4*LH)
    g0_all = jnp.dot(seq, wih0, preferred_element_type=jnp.float32) + bg0

    h0 = jnp.zeros((1, LH), jnp.float32)
    c0 = jnp.zeros((1, LH), jnp.float32)
    h1 = jnp.zeros((1, LH), jnp.float32)
    c1 = jnp.zeros((1, LH), jnp.float32)

    for t in range(T):                             # T small & static: unroll
        g0 = g0_all[t:t + 1, :] + jnp.dot(
            h0, whh0, preferred_element_type=jnp.float32)
        h0, c0 = gates_to_hc(g0, c0)
        # layer 1: two dots + VPU add (no per-step lane concat)
        g1 = (jnp.dot(h0, wih1, preferred_element_type=jnp.float32)
              + jnp.dot(h1, whh1, preferred_element_type=jnp.float32)
              + bg1)
        h1, c1 = gates_to_hc(g1, c1)

    # ---- final Linear on the last timestep (lane-dense 4*LH-wide store)
    out_ref[...] = (jnp.dot(h1, wlin, preferred_element_type=jnp.float32)
                    + blin)


# ----------------------------------------------------------------------------
# Wrapper: layout plumbing (operand packing, block-diag adjacency, padding)
# ----------------------------------------------------------------------------
@jax.jit
def tgcn_forward(a_all, x_all, params):
    """a_all: (T, N, N) normalized adjacency per timestep; x_all: (T, N, F).

    Returns (1, num_classes), matching the torch module's forward output.
    """
    T, N, _ = a_all.shape
    F = x_all.shape[-1]
    GH = params["gcn1_w"].shape[1]                 # gcn_hidden
    LH = params["w_hh0"].shape[1]                  # lstm_hidden
    C = params["w_lin"].shape[0]
    W4 = 4 * LH
    assert W4 >= GH and W4 >= C, "bias/linear padding assumes 4*lstm_hidden is widest"

    # Block-diagonal adjacency: a_bd[t*N+i, s*N+j] = (t == s) * a_all[t, i, j].
    # Valid with per-timestep adjacency; one lane-dense MXU matmul in-kernel.
    eye_t = jnp.eye(T, dtype=jnp.float32)
    a_bd = (eye_t[:, :, None, None] * a_all[:, None, :, :])
    a_bd = a_bd.transpose(0, 2, 1, 3).reshape(T * N, T * N)

    # Pad the feature dim to a sublane multiple so the GCN weight slab slices
    # stay 8-aligned.
    F_pad = ((F + 7) // 8) * 8
    x_flat = jnp.pad(x_all.reshape(T * N, F), ((0, 0), (0, F_pad - F)))

    # GCN weight slab: [gcn1_w (F_pad, GH) ; gcn2_w (GH, GH)] on rows.
    gcn1_w_pad = jnp.pad(params["gcn1_w"], ((0, F_pad - F), (0, 0)))
    gcn_w_slab = jnp.concatenate([gcn1_w_pad, params["gcn2_w"]], axis=0)

    # LSTM + Linear weight slab (all transposed so the kernel does x @ W).
    wlin_pad = jnp.pad(params["w_lin"].T, ((0, 0), (0, W4 - C)))
    lstm_w_slab = jnp.concatenate(
        [params["w_ih0"].T, params["w_hh0"].T,
         params["w_ih1"].T, params["w_hh1"].T, wlin_pad], axis=0)

    # Bias slab: one (5, 4*LH) array, each row zero-padded to 4*LH lanes.
    def pad_row(v):
        return jnp.pad(v, (0, W4 - v.shape[0]))
    bias_slab = jnp.stack([
        pad_row(params["gcn1_b"]),
        pad_row(params["gcn2_b"]),
        params["b_ih0"] + params["b_hh0"],
        params["b_ih1"] + params["b_hh1"],
        pad_row(params["b_lin"]),
    ], axis=0)

    kernel = functools.partial(tgcn_fused_kernel,
                               T=T, N=N, F_pad=F_pad, GH=GH, LH=LH)
    out_padded = pl.pallas_call(
        kernel,
        out_shape=jax.ShapeDtypeStruct((1, W4), jnp.float32),
    )(a_bd, x_flat, gcn_w_slab, lstm_w_slab, bias_slab)

    return out_padded[:, :C]


# ----------------------------------------------------------------------------
# Pure-JAX reference (for a correctness check of the Pallas kernel)
# ----------------------------------------------------------------------------
def tgcn_reference(a_all, x_all, params):
    T = a_all.shape[0]
    embs = []
    for t in range(T):
        a, x = a_all[t], x_all[t]
        h = jnp.maximum(a @ (x @ params["gcn1_w"]) + params["gcn1_b"], 0.0)
        h = jnp.maximum(a @ (h @ params["gcn2_w"]) + params["gcn2_b"], 0.0)
        embs.append(h.mean(axis=0))
    seq = jnp.stack(embs)                                  # (T, GH)

    Hl = params["w_hh0"].shape[1]

    def cell(x_t, h, c, w_ih, w_hh, b_ih, b_hh):
        g = x_t @ w_ih.T + h @ w_hh.T + b_ih + b_hh
        i = jax.nn.sigmoid(g[0 * Hl:1 * Hl])
        f = jax.nn.sigmoid(g[1 * Hl:2 * Hl])
        gg = jnp.tanh(g[2 * Hl:3 * Hl])
        o = jax.nn.sigmoid(g[3 * Hl:4 * Hl])
        c = f * c + i * gg
        return o * jnp.tanh(c), c

    h0 = c0 = h1 = c1 = jnp.zeros((Hl,), jnp.float32)
    for t in range(T):
        h0, c0 = cell(seq[t], h0, c0, params["w_ih0"], params["w_hh0"],
                      params["b_ih0"], params["b_hh0"])
        h1, c1 = cell(h0, h1, c1, params["w_ih1"], params["w_hh1"],
                      params["b_ih1"], params["b_hh1"])
    return (h1 @ params["w_lin"].T + params["b_lin"])[None, :]


# ----------------------------------------------------------------------------
# Helper: dense normalized adjacency (PyG GCNConv style) from edge_index
# ----------------------------------------------------------------------------
def build_norm_adj(edge_index, num_nodes):
    src, dst = edge_index
    a = jnp.zeros((num_nodes, num_nodes), jnp.float32).at[dst, src].add(1.0)
    a = a + jnp.eye(num_nodes, dtype=jnp.float32)          # add self-loops
    deg = a.sum(axis=1)
    d_inv_sqrt = 1.0 / jnp.sqrt(deg)
    return a * d_inv_sqrt[:, None] * d_inv_sqrt[None, :]


if __name__ == "__main__":
    # Small shapes consistent with the module's forward.
    T = 8            # number of timesteps (len(x_list)); 1 graph per timestep
    N = 16           # nodes per graph
    F = 4            # node_features
    GCN_H = 32       # gcn_hidden
    LSTM_H = 32      # lstm_hidden
    C = 3            # num_classes

    key = jax.random.PRNGKey(0)
    keys = jax.random.split(key, 16)

    # Node features per timestep: (T, N, F).
    x_all = jax.random.normal(keys[0], (T, N, F), jnp.float32)

    # Per-timestep graphs (adjacency varies across timesteps to exercise the
    # general block-diagonal path): even steps ring graph, odd steps += skip-2
    # chords.  Batch vector is implicitly all-zeros (single graph / timestep).
    idx = jnp.arange(N)
    ring_src = jnp.concatenate([idx, (idx + 1) % N])
    ring_dst = jnp.concatenate([(idx + 1) % N, idx])
    a_ring = build_norm_adj((ring_src, ring_dst), N)

    skip_src = jnp.concatenate([ring_src, idx, (idx + 2) % N])
    skip_dst = jnp.concatenate([ring_dst, (idx + 2) % N, idx])
    a_skip = build_norm_adj((skip_src, skip_dst), N)

    a_all = jnp.stack([a_ring if (t % 2 == 0) else a_skip for t in range(T)])

    def init(k, shape, scale=0.1):
        return scale * jax.random.normal(k, shape, jnp.float32)

    params = {
        # GCNConv weights (stored as (in, out) so the kernel does x @ W)
        "gcn1_w": init(keys[1], (F, GCN_H)),
        "gcn1_b": init(keys[2], (GCN_H,)),
        "gcn2_w": init(keys[3], (GCN_H, GCN_H)),
        "gcn2_b": init(keys[4], (GCN_H,)),
        # LSTM layer 0 (PyTorch layout: (4*H, in), gate order i,f,g,o)
        "w_ih0": init(keys[5], (4 * LSTM_H, GCN_H)),
        "w_hh0": init(keys[6], (4 * LSTM_H, LSTM_H)),
        "b_ih0": init(keys[7], (4 * LSTM_H,)),
        "b_hh0": init(keys[8], (4 * LSTM_H,)),
        # LSTM layer 1
        "w_ih1": init(keys[9], (4 * LSTM_H, LSTM_H)),
        "w_hh1": init(keys[10], (4 * LSTM_H, LSTM_H)),
        "b_ih1": init(keys[11], (4 * LSTM_H,)),
        "b_hh1": init(keys[12], (4 * LSTM_H,)),
        # Final linear (PyTorch layout: (out, in))
        "w_lin": init(keys[13], (C, LSTM_H)),
        "b_lin": init(keys[14], (C,)),
    }

    out = tgcn_forward(a_all, x_all, params)
    out = jax.block_until_ready(out)

    ref = tgcn_reference(a_all, x_all, params)
    assert out.shape == (1, C)
    assert jnp.allclose(out, ref, atol=1e-4, rtol=1e-4), (out, ref)

    print("KERNEL_OK")
</pallas_src>

<mosaic_0001>
module attributes {stable_mosaic.version = 11 : i64} {
  func.func @tgcn_fused_kernel(%arg0: memref<128x128xf32, #tpu.memory_space<vmem>>, %arg1: memref<128x8xf32, #tpu.memory_space<vmem>>, %arg2: memref<40x32xf32, #tpu.memory_space<vmem>>, %arg3: memref<160x128xf32, #tpu.memory_space<vmem>>, %arg4: memref<5x128xf32, #tpu.memory_space<vmem>>, %arg5: memref<1x128xf32, #tpu.memory_space<vmem>>) attributes {dimension_semantics = [], scalar_prefetch = 0 : i64, scratch_operands = 0 : i64, tpu.core_type = #tpu.core_type<tc>} {
    %c0 = arith.constant 0 : index
    %c0_0 = arith.constant 0 : index
    %0 = vector.load %arg0[%c0, %c0_0] : memref<128x128xf32, #tpu.memory_space<vmem>>, vector<128x128xf32>
    %c0_1 = arith.constant 0 : index
    %c0_2 = arith.constant 0 : index
    %1 = vector.load %arg1[%c0_1, %c0_2] : memref<128x8xf32, #tpu.memory_space<vmem>>, vector<128x8xf32>
    %c0_3 = arith.constant 0 : index
    %c0_4 = arith.constant 0 : index
    %2 = vector.load %arg2[%c0_3, %c0_4] : memref<40x32xf32, #tpu.memory_space<vmem>>, vector<40x32xf32>
    %3 = vector.extract_strided_slice %2 {offsets = [0, 0], sizes = [8, 32], strides = [1, 1]} : vector<40x32xf32> to vector<8x32xf32>
    %4 = vector.extract_strided_slice %2 {offsets = [8, 0], sizes = [32, 32], strides = [1, 1]} : vector<40x32xf32> to vector<32x32xf32>
    %c0_5 = arith.constant 0 : index
    %c0_6 = arith.constant 0 : index
    %5 = vector.load %arg4[%c0_5, %c0_6] : memref<5x128xf32, #tpu.memory_space<vmem>>, vector<5x128xf32>
    %6 = vector.extract_strided_slice %5 {offsets = [0, 0], sizes = [1, 32], strides = [1, 1]} : vector<5x128xf32> to vector<1x32xf32>
    %7 = vector.extract_strided_slice %5 {offsets = [1, 0], sizes = [1, 32], strides = [1, 1]} : vector<5x128xf32> to vector<1x32xf32>
    %8 = vector.extract_strided_slice %5 {offsets = [2, 0], sizes = [1, 128], strides = [1, 1]} : vector<5x128xf32> to vector<1x128xf32>
    %9 = vector.extract_strided_slice %5 {offsets = [3, 0], sizes = [1, 128], strides = [1, 1]} : vector<5x128xf32> to vector<1x128xf32>
    %10 = vector.extract_strided_slice %5 {offsets = [4, 0], sizes = [1, 128], strides = [1, 1]} : vector<5x128xf32> to vector<1x128xf32>
    %cst = arith.constant dense<0.000000e+00> : vector<128x32xf32>
    %11 = tpu.matmul %1, %3, %cst {dimension_numbers = #tpu.dot_dimension_numbers<[1], [0], [0], [1], [0, 0, 1, 1], [], []>} : vector<128x8xf32>, vector<8x32xf32>, vector<128x32xf32> -> vector<128x32xf32>
    %cst_7 = arith.constant dense<0.000000e+00> : vector<128x32xf32>
    %12 = tpu.matmul %0, %11, %cst_7 {dimension_numbers = #tpu.dot_dimension_numbers<[1], [0], [0], [1], [0, 0, 1, 1], [], []>} : vector<128x128xf32>, vector<128x32xf32>, vector<128x32xf32> -> vector<128x32xf32>
    %13 = vector.broadcast %6 : vector<1x32xf32> to vector<128x32xf32>
    %14 = arith.addf %12, %13 : vector<128x32xf32>
    %cst_8 = arith.constant 0.000000e+00 : f32
    %15 = vector.broadcast %cst_8 : f32 to vector<128x32xf32>
    %16 = arith.maximumf %14, %15 : vector<128x32xf32>
    %cst_9 = arith.constant dense<0.000000e+00> : vector<128x32xf32>
    %17 = tpu.matmul %16, %4, %cst_9 {dimension_numbers = #tpu.dot_dimension_numbers<[1], [0], [0], [1], [0, 0, 1, 1], [], []>} : vector<128x32xf32>, vector<32x32xf32>, vector<128x32xf32> -> vector<128x32xf32>
    %cst_10 = arith.constant dense<0.000000e+00> : vector<128x32xf32>
    %18 = tpu.matmul %0, %17, %cst_10 {dimension_numbers = #tpu.dot_dimension_numbers<[1], [0], [0], [1], [0, 0, 1, 1], [], []>} : vector<128x128xf32>, vector<128x32xf32>, vector<128x32xf32> -> vector<128x32xf32>
    %19 = vector.broadcast %7 : vector<1x32xf32> to vector<128x32xf32>
    %20 = arith.addf %18, %19 : vector<128x32xf32>
    %cst_11 = arith.constant 0.000000e+00 : f32
    %21 = vector.broadcast %cst_11 : f32 to vector<128x32xf32>
    %22 = arith.maximumf %20, %21 : vector<128x32xf32>
    %23 = tpu.iota {dimensions = array<i32: 0>} : vector<8x128xi32>
    %24 = tpu.iota {dimensions = array<i32: 1>} : vector<8x128xi32>
    %c16_i32 = arith.constant 16 : i32
    %25 = vector.broadcast %c16_i32 : i32 to vector<8x128xi32>
    %26 = arith.muli %23, %25 : vector<8x128xi32>
    %27 = arith.cmpi sge, %24, %26 : vector<8x128xi32>
    %c16_i32_12 = arith.constant 16 : i32
    %28 = vector.broadcast %c16_i32_12 : i32 to vector<8x128xi32>
    %29 = arith.addi %26, %28 : vector<8x128xi32>
    %30 = arith.cmpi slt, %24, %29 : vector<8x128xi32>
    %31 = arith.andi %27, %30 : vector<8x128xi1>
    %cst_13 = arith.constant 6.250000e-02 : f32
    %cst_14 = arith.constant 0.000000e+00 : f32
    %32 = vector.broadcast %cst_13 : f32 to vector<8x128xf32>
    %33 = vector.broadcast %cst_14 : f32 to vector<8x128xf32>
    %34 = arith.select %31, %32, %33 : vector<8x128xi1>, vector<8x128xf32>
    %cst_15 = arith.constant dense<0.000000e+00> : vector<8x32xf32>
    %35 = tpu.matmul %34, %22, %cst_15 {dimension_numbers = #tpu.dot_dimension_numbers<[1], [0], [0], [1], [0, 0, 1, 1], [], []>} : vector<8x128xf32>, vector<128x32xf32>, vector<8x32xf32> -> vector<8x32xf32>
    %c0_16 = arith.constant 0 : index
    %c0_17 = arith.constant 0 : index
    %36 = vector.load %arg3[%c0_16, %c0_17] : memref<160x128xf32, #tpu.memory_space<vmem>>, vector<160x128xf32>
    %37 = vector.extract_strided_slice %36 {offsets = [0, 0], sizes = [32, 128], strides = [1, 1]} : vector<160x128xf32> to vector<32x128xf32>
    %38 = vector.extract_strided_slice %36 {offsets = [32, 0], sizes = [32, 128], strides = [1, 1]} : vector<160x128xf32> to vector<32x128xf32>
    %39 = vector.extract_strided_slice %36 {offsets = [64, 0], sizes = [32, 128], strides = [1, 1]} : vector<160x128xf32> to vector<32x128xf32>
    %40 = vector.extract_strided_slice %36 {offsets = [96, 0], sizes = [32, 128], strides = [1, 1]} : vector<160x128xf32> to vector<32x128xf32>
    %41 = vector.extract_strided_slice %36 {offsets = [128, 0], sizes = [32, 128], strides = [1, 1]} : vector<160x128xf32> to vector<32x128xf32>
    %cst_18 = arith.constant dense<0.000000e+00> : vector<8x128xf32>
    %42 = tpu.matmul %35, %37, %cst_18 {dimension_numbers = #tpu.dot_dimension_numbers<[1], [0], [0], [1], [0, 0, 1, 1], [], []>} : vector<8x32xf32>, vector<32x128xf32>, vector<8x128xf32> -> vector<8x128xf32>
    %43 = vector.broadcast %8 : vector<1x128xf32> to vector<8x128xf32>
    %44 = arith.addf %42, %43 : vector<8x128xf32>
    %cst_19 = arith.constant 0.000000e+00 : f32
    %45 = vector.broadcast %cst_19 : f32 to vector<1x32xf32>
    %cst_20 = arith.constant 0.000000e+00 : f32
    %46 = vector.broadcast %cst_20 : f32 to vector<1x32xf32>
    %cst_21 = arith.constant 0.000000e+00 : f32
    %47 = vector.broadcast %cst_21 : f32 to vector<1x32xf32>
    %cst_22 = arith.constant 0.000000e+00 : f32
    %48 = vector.broadcast %cst_22 : f32 to vector<1x32xf32>
    %49 = vector.extract_strided_slice %44 {offsets = [0, 0], sizes = [1, 128], strides = [1, 1]} : vector<8x128xf32> to vector<1x128xf32>
    %cst_23 = arith.constant dense<0.000000e+00> : vector<1x128xf32>
    %50 = tpu.matmul %45, %38, %cst_23 {dimension_numbers = #tpu.dot_dimension_numbers<[1], [0], [0], [1], [0, 0, 1, 1], [], []>} : vector<1x32xf32>, vector<32x128xf32>, vector<1x128xf32> -> vector<1x128xf32>
    %51 = arith.addf %49, %50 : vector<1x128xf32>
    %52 = arith.negf %51 : vector<1x128xf32>
    %53 = math.exp %52 : vector<1x128xf32>
    %cst_24 = arith.constant 1.000000e+00 : f32
    %54 = vector.broadcast %cst_24 : f32 to vector<1x128xf32>
    %55 = arith.addf %54, %53 : vector<1x128xf32>
    %56 = arith.divf %54, %55 : vector<1x128xf32>
    %57 = vector.extract_strided_slice %56 {offsets = [0, 0], sizes = [1, 32], strides = [1, 1]} : vector<1x128xf32> to vector<1x32xf32>
    %58 = vector.extract_strided_slice %56 {offsets = [0, 32], sizes = [1, 32], strides = [1, 1]} : vector<1x128xf32> to vector<1x32xf32>
    %59 = vector.extract_strided_slice %56 {offsets = [0, 96], sizes = [1, 32], strides = [1, 1]} : vector<1x128xf32> to vector<1x32xf32>
    %60 = vector.extract_strided_slice %51 {offsets = [0, 64], sizes = [1, 32], strides = [1, 1]} : vector<1x128xf32> to vector<1x32xf32>
    %61 = math.tanh %60 : vector<1x32xf32>
    %62 = arith.mulf %58, %46 : vector<1x32xf32>
    %63 = arith.mulf %57, %61 : vector<1x32xf32>
    %64 = arith.addf %62, %63 : vector<1x32xf32>
    %65 = math.tanh %64 : vector<1x32xf32>
    %66 = arith.mulf %59, %65 : vector<1x32xf32>
    %cst_25 = arith.constant dense<0.000000e+00> : vector<1x128xf32>
    %67 = tpu.matmul %66, %39, %cst_25 {dimension_numbers = #tpu.dot_dimension_numbers<[1], [0], [0], [1], [0, 0, 1, 1], [], []>} : vector<1x32xf32>, vector<32x128xf32>, vector<1x128xf32> -> vector<1x128xf32>
    %cst_26 = arith.constant dense<0.000000e+00> : vector<1x128xf32>
    %68 = tpu.matmul %47, %40, %cst_26 {dimension_numbers = #tpu.dot_dimension_numbers<[1], [0], [0], [1], [0, 0, 1, 1], [], []>} : vector<1x32xf32>, vector<32x128xf32>, vector<1x128xf32> -> vector<1x128xf32>
    %69 = arith.addf %67, %68 : vector<1x128xf32>
    %70 = arith.addf %69, %9 : vector<1x128xf32>
    %71 = arith.negf %70 : vector<1x128xf32>
    %72 = math.exp %71 : vector<1x128xf32>
    %cst_27 = arith.constant 1.000000e+00 : f32
    %73 = vector.broadcast %cst_27 : f32 to vector<1x128xf32>
    %74 = arith.addf %73, %72 : vector<1x128xf32>
    %75 = arith.divf %73, %74 : vector<1x128xf32>
    %76 = vector.extract_strided_slice %75 {offsets = [0, 0], sizes = [1, 32], strides = [1, 1]} : vector<1x128xf32> to vector<1x32xf32>
    %77 = vector.extract_strided_slice %75 {offsets = [0, 32], sizes = [1, 32], strides = [1, 1]} : vector<1x128xf32> to vector<1x32xf32>
    %78 = vector.extract_strided_slice %75 {offsets = [0, 96], sizes = [1, 32], strides = [1, 1]} : vector<1x128xf32> to vector<1x32xf32>
    %79 = vector.extract_strided_slice %70 {offsets = [0, 64], sizes = [1, 32], strides = [1, 1]} : vector<1x128xf32> to vector<1x32xf32>
    %80 = math.tanh %79 : vector<1x32xf32>
    %81 = arith.mulf %77, %48 : vector<1x32xf32>
    %82 = arith.mulf %76, %80 : vector<1x32xf32>
    %83 = arith.addf %81, %82 : vector<1x32xf32>
    %84 = math.tanh %83 : vector<1x32xf32>
    %85 = arith.mulf %78, %84 : vector<1x32xf32>
    %86 = vector.extract_strided_slice %44 {offsets = [1, 0], sizes = [1, 128], strides = [1, 1]} : vector<8x128xf32> to vector<1x128xf32>
    %cst_28 = arith.constant dense<0.000000e+00> : vector<1x128xf32>
    %87 = tpu.matmul %66, %38, %cst_28 {dimension_numbers = #tpu.dot_dimension_numbers<[1], [0], [0], [1], [0, 0, 1, 1], [], []>} : vector<1x32xf32>, vector<32x128xf32>, vector<1x128xf32> -> vector<1x128xf32>
    %88 = arith.addf %86, %87 : vector<1x128xf32>
    %89 = arith.negf %88 : vector<1x128xf32>
    %90 = math.exp %89 : vector<1x128xf32>
    %cst_29 = arith.constant 1.000000e+00 : f32
    %91 = vector.broadcast %cst_29 : f32 to vector<1x128xf32>
    %92 = arith.addf %91, %90 : vector<1x128xf32>
    %93 = arith.divf %91, %92 : vector<1x128xf32>
    %94 = vector.extract_strided_slice %93 {offsets = [0, 0], sizes = [1, 32], strides = [1, 1]} : vector<1x128xf32> to vector<1x32xf32>
    %95 = vector.extract_strided_slice %93 {offsets = [0, 32], sizes = [1, 32], strides = [1, 1]} : vector<1x128xf32> to vector<1x32xf32>
    %96 = vector.extract_strided_slice %93 {offsets = [0, 96], sizes = [1, 32], strides = [1, 1]} : vector<1x128xf32> to vector<1x32xf32>
    %97 = vector.extract_strided_slice %88 {offsets = [0, 64], sizes = [1, 32], strides = [1, 1]} : vector<1x128xf32> to vector<1x32xf32>
    %98 = math.tanh %97 : vector<1x32xf32>
    %99 = arith.mulf %95, %64 : vector<1x32xf32>
    %100 = arith.mulf %94, %98 : vector<1x32xf32>
    %101 = arith.addf %99, %100 : vector<1x32xf32>
    %102 = math.tanh %101 : vector<1x32xf32>
    %103 = arith.mulf %96, %102 : vector<1x32xf32>
    %cst_30 = arith.constant dense<0.000000e+00> : vector<1x128xf32>
    %104 = tpu.matmul %103, %39, %cst_30 {dimension_numbers = #tpu.dot_dimension_numbers<[1], [0], [0], [1], [0, 0, 1, 1], [], []>} : vector<1x32xf32>, vector<32x128xf32>, vector<1x128xf32> -> vector<1x128xf32>
    %cst_31 = arith.constant dense<0.000000e+00> : vector<1x128xf32>
    %105 = tpu.matmul %85, %40, %cst_31 {dimension_numbers = #tpu.dot_dimension_numbers<[1], [0], [0], [1], [0, 0, 1, 1], [], []>} : vector<1x32xf32>, vector<32x128xf32>, vector<1x128xf32> -> vector<1x128xf32>
    %106 = arith.addf %104, %105 : vector<1x128xf32>
    %107 = arith.addf %106, %9 : vector<1x128xf32>
    %108 = arith.negf %107 : vector<1x128xf32>
    %109 = math.exp %108 : vector<1x128xf32>
    %cst_32 = arith.constant 1.000000e+00 : f32
    %110 = vector.broadcast %cst_32 : f32 to vector<1x128xf32>
    %111 = arith.addf %110, %109 : vector<1x128xf32>
    %112 = arith.divf %110, %111 : vector<1x128xf32>
    %113 = vector.extract_strided_slice %112 {offsets = [0, 0], sizes = [1, 32], strides = [1, 1]} : vector<1x128xf32> to vector<1x32xf32>
    %114 = vector.extract_strided_slice %112 {offsets = [0, 32], sizes = [1, 32], strides = [1, 1]} : vector<1x128xf32> to vector<1x32xf32>
    %115 = vector.extract_strided_slice %112 {offsets = [0, 96], sizes = [1, 32], strides = [1, 1]} : vector<1x128xf32> to vector<1x32xf32>
    %116 = vector.extract_strided_slice %107 {offsets = [0, 64], sizes = [1, 32], strides = [1, 1]} : vector<1x128xf32> to vector<1x32xf32>
    %117 = math.tanh %116 : vector<1x32xf32>
    %118 = arith.mulf %114, %83 : vector<1x32xf32>
    %119 = arith.mulf %113, %117 : vector<1x32xf32>
    %120 = arith.addf %118, %119 : vector<1x32xf32>
    %121 = math.tanh %120 : vector<1x32xf32>
    %122 = arith.mulf %115, %121 : vector<1x32xf32>
    %123 = vector.extract_strided_slice %44 {offsets = [2, 0], sizes = [1, 128], strides = [1, 1]} : vector<8x128xf32> to vector<1x128xf32>
    %cst_33 = arith.constant dense<0.000000e+00> : vector<1x128xf32>
    %124 = tpu.matmul %103, %38, %cst_33 {dimension_numbers = #tpu.dot_dimension_numbers<[1], [0], [0], [1], [0, 0, 1, 1], [], []>} : vector<1x32xf32>, vector<32x128xf32>, vector<1x128xf32> -> vector<1x128xf32>
    %125 = arith.addf %123, %124 : vector<1x128xf32>
    %126 = arith.negf %125 : vector<1x128xf32>
    %127 = math.exp %126 : vector<1x128xf32>
    %cst_34 = arith.constant 1.000000e+00 : f32
    %128 = vector.broadcast %cst_34 : f32 to vector<1x128xf32>
    %129 = arith.addf %128, %127 : vector<1x128xf32>
    %130 = arith.divf %128, %129 : vector<1x128xf32>
    %131 = vector.extract_strided_slice %130 {offsets = [0, 0], sizes = [1, 32], strides = [1, 1]} : vector<1x128xf32> to vector<1x32xf32>
    %132 = vector.extract_strided_slice %130 {offsets = [0, 32], sizes = [1, 32], strides = [1, 1]} : vector<1x128xf32> to vector<1x32xf32>
    %133 = vector.extract_strided_slice %130 {offsets = [0, 96], sizes = [1, 32], strides = [1, 1]} : vector<1x128xf32> to vector<1x32xf32>
    %134 = vector.extract_strided_slice %125 {offsets = [0, 64], sizes = [1, 32], strides = [1, 1]} : vector<1x128xf32> to vector<1x32xf32>
    %135 = math.tanh %134 : vector<1x32xf32>
    %136 = arith.mulf %132, %101 : vector<1x32xf32>
    %137 = arith.mulf %131, %135 : vector<1x32xf32>
    %138 = arith.addf %136, %137 : vector<1x32xf32>
    %139 = math.tanh %138 : vector<1x32xf32>
    %140 = arith.mulf %133, %139 : vector<1x32xf32>
    %cst_35 = arith.constant dense<0.000000e+00> : vector<1x128xf32>
    %141 = tpu.matmul %140, %39, %cst_35 {dimension_numbers = #tpu.dot_dimension_numbers<[1], [0], [0], [1], [0, 0, 1, 1], [], []>} : vector<1x32xf32>, vector<32x128xf32>, vector<1x128xf32> -> vector<1x128xf32>
    %cst_36 = arith.constant dense<0.000000e+00> : vector<1x128xf32>
    %142 = tpu.matmul %122, %40, %cst_36 {dimension_numbers = #tpu.dot_dimension_numbers<[1], [0], [0], [1], [0, 0, 1, 1], [], []>} : vector<1x32xf32>, vector<32x128xf32>, vector<1x128xf32> -> vector<1x128xf32>
    %143 = arith.addf %141, %142 : vector<1x128xf32>
    %144 = arith.addf %143, %9 : vector<1x128xf32>
    %145 = arith.negf %144 : vector<1x128xf32>
    %146 = math.exp %145 : vector<1x128xf32>
    %cst_37 = arith.constant 1.000000e+00 : f32
    %147 = vector.broadcast %cst_37 : f32 to vector<1x128xf32>
    %148 = arith.addf %147, %146 : vector<1x128xf32>
    %149 = arith.divf %147, %148 : vector<1x128xf32>
    %150 = vector.extract_strided_slice %149 {offsets = [0, 0], sizes = [1, 32], strides = [1, 1]} : vector<1x128xf32> to vector<1x32xf32>
    %151 = vector.extract_strided_slice %149 {offsets = [0, 32], sizes = [1, 32], strides = [1, 1]} : vector<1x128xf32> to vector<1x32xf32>
    %152 = vector.extract_strided_slice %149 {offsets = [0, 96], sizes = [1, 32], strides = [1, 1]} : vector<1x128xf32> to vector<1x32xf32>
    %153 = vector.extract_strided_slice %144 {offsets = [0, 64], sizes = [1, 32], strides = [1, 1]} : vector<1x128xf32> to vector<1x32xf32>
    %154 = math.tanh %153 : vector<1x32xf32>
    %155 = arith.mulf %151, %120 : vector<1x32xf32>
    %156 = arith.mulf %150, %154 : vector<1x32xf32>
    %157 = arith.addf %155, %156 : vector<1x32xf32>
    %158 = math.tanh %157 : vector<1x32xf32>
    %159 = arith.mulf %152, %158 : vector<1x32xf32>
    %160 = vector.extract_strided_slice %44 {offsets = [3, 0], sizes = [1, 128], strides = [1, 1]} : vector<8x128xf32> to vector<1x128xf32>
    %cst_38 = arith.constant dense<0.000000e+00> : vector<1x128xf32>
    %161 = tpu.matmul %140, %38, %cst_38 {dimension_numbers = #tpu.dot_dimension_numbers<[1], [0], [0], [1], [0, 0, 1, 1], [], []>} : vector<1x32xf32>, vector<32x128xf32>, vector<1x128xf32> -> vector<1x128xf32>
    %162 = arith.addf %160, %161 : vector<1x128xf32>
    %163 = arith.negf %162 : vector<1x128xf32>
    %164 = math.exp %163 : vector<1x128xf32>
    %cst_39 = arith.constant 1.000000e+00 : f32
    %165 = vector.broadcast %cst_39 : f32 to vector<1x128xf32>
    %166 = arith.addf %165, %164 : vector<1x128xf32>
    %167 = arith.divf %165, %166 : vector<1x128xf32>
    %168 = vector.extract_strided_slice %167 {offsets = [0, 0], sizes = [1, 32], strides = [1, 1]} : vector<1x128xf32> to vector<1x32xf32>
    %169 = vector.extract_strided_slice %167 {offsets = [0, 32], sizes = [1, 32], strides = [1, 1]} : vector<1x128xf32> to vector<1x32xf32>
    %170 = vector.extract_strided_slice %167 {offsets = [0, 96], sizes = [1, 32], strides = [1, 1]} : vector<1x128xf32> to vector<1x32xf32>
    %171 = vector.extract_strided_slice %162 {offsets = [0, 64], sizes = [1, 32], strides = [1, 1]} : vector<1x128xf32> to vector<1x32xf32>
    %172 = math.tanh %171 : vector<1x32xf32>
    %173 = arith.mulf %169, %138 : vector<1x32xf32>
    %174 = arith.mulf %168, %172 : vector<1x32xf32>
    %175 = arith.addf %173, %174 : vector<1x32xf32>
    %176 = math.tanh %175 : vector<1x32xf32>
    %177 = arith.mulf %170, %176 : vector<1x32xf32>
    %cst_40 = arith.constant dense<0.000000e+00> : vector<1x128xf32>
    %178 = tpu.matmul %177, %39, %cst_40 {dimension_numbers = #tpu.dot_dimension_numbers<[1], [0], [0], [1], [0, 0, 1, 1], [], []>} : vector<1x32xf32>, vector<32x128xf32>, vector<1x128xf32> -> vector<1x128xf32>
    %cst_41 = arith.constant dense<0.000000e+00> : vector<1x128xf32>
    %179 = tpu.matmul %159, %40, %cst_41 {dimension_numbers = #tpu.dot_dimension_numbers<[1], [0], [0], [1], [0, 0, 1, 1], [], []>} : vector<1x32xf32>, vector<32x128xf32>, vector<1x128xf32> -> vector<1x128xf32>
    %180 = arith.addf %178, %179 : vector<1x128xf32>
    %181 = arith.addf %180, %9 : vector<1x128xf32>
    %182 = arith.negf %181 : vector<1x128xf32>
    %183 = math.exp %182 : vector<1x128xf32>
    %cst_42 = arith.constant 1.000000e+00 : f32
    %184 = vector.broadcast %cst_42 : f32 to vector<1x128xf32>
    %185 = arith.addf %184, %183 : vector<1x128xf32>
    %186 = arith.divf %184, %185 : vector<1x128xf32>
    %187 = vector.extract_strided_slice %186 {offsets = [0, 0], sizes = [1, 32], strides = [1, 1]} : vector<1x128xf32> to vector<1x32xf32>
    %188 = vector.extract_strided_slice %186 {offsets = [0, 32], sizes = [1, 32], strides = [1, 1]} : vector<1x128xf32> to vector<1x32xf32>
    %189 = vector.extract_strided_slice %186 {offsets = [0, 96], sizes = [1, 32], strides = [1, 1]} : vector<1x128xf32> to vector<1x32xf32>
    %190 = vector.extract_strided_slice %181 {offsets = [0, 64], sizes = [1, 32], strides = [1, 1]} : vector<1x128xf32> to vector<1x32xf32>
    %191 = math.tanh %190 : vector<1x32xf32>
    %192 = arith.mulf %188, %157 : vector<1x32xf32>
    %193 = arith.mulf %187, %191 : vector<1x32xf32>
    %194 = arith.addf %192, %193 : vector<1x32xf32>
    %195 = math.tanh %194 : vector<1x32xf32>
    %196 = arith.mulf %189, %195 : vector<1x32xf32>
    %197 = vector.extract_strided_slice %44 {offsets = [4, 0], sizes = [1, 128], strides = [1, 1]} : vector<8x128xf32> to vector<1x128xf32>
    %cst_43 = arith.constant dense<0.000000e+00> : vector<1x128xf32>
    %198 = tpu.matmul %177, %38, %cst_43 {dimension_numbers = #tpu.dot_dimension_numbers<[1], [0], [0], [1], [0, 0, 1, 1], [], []>} : vector<1x32xf32>, vector<32x128xf32>, vector<1x128xf32> -> vector<1x128xf32>
    %199 = arith.addf %197, %198 : vector<1x128xf32>
    %200 = arith.negf %199 : vector<1x128xf32>
    %201 = math.exp %200 : vector<1x128xf32>
    %cst_44 = arith.constant 1.000000e+00 : f32
    %202 = vector.broadcast %cst_44 : f32 to vector<1x128xf32>
    %203 = arith.addf %202, %201 : vector<1x128xf32>
    %204 = arith.divf %202, %203 : vector<1x128xf32>
    %205 = vector.extract_strided_slice %204 {offsets = [0, 0], sizes = [1, 32], strides = [1, 1]} : vector<1x128xf32> to vector<1x32xf32>
    %206 = vector.extract_strided_slice %204 {offsets = [0, 32], sizes = [1, 32], strides = [1, 1]} : vector<1x128xf32> to vector<1x32xf32>
    %207 = vector.extract_strided_slice %204 {offsets = [0, 96], sizes = [1, 32], strides = [1, 1]} : vector<1x128xf32> to vector<1x32xf32>
    %208 = vector.extract_strided_slice %199 {offsets = [0, 64], sizes = [1, 32], strides = [1, 1]} : vector<1x128xf32> to vector<1x32xf32>
    %209 = math.tanh %208 : vector<1x32xf32>
    %210 = arith.mulf %206, %175 : vector<1x32xf32>
    %211 = arith.mulf %205, %209 : vector<1x32xf32>
    %212 = arith.addf %210, %211 : vector<1x32xf32>
    %213 = math.tanh %212 : vector<1x32xf32>
    %214 = arith.mulf %207, %213 : vector<1x32xf32>
    %cst_45 = arith.constant dense<0.000000e+00> : vector<1x128xf32>
    %215 = tpu.matmul %214, %39, %cst_45 {dimension_numbers = #tpu.dot_dimension_numbers<[1], [0], [0], [1], [0, 0, 1, 1], [], []>} : vector<1x32xf32>, vector<32x128xf32>, vector<1x128xf32> -> vector<1x128xf32>
    %cst_46 = arith.constant dense<0.000000e+00> : vector<1x128xf32>
    %216 = tpu.matmul %196, %40, %cst_46 {dimension_numbers = #tpu.dot_dimension_numbers<[1], [0], [0], [1], [0, 0, 1, 1], [], []>} : vector<1x32xf32>, vector<32x128xf32>, vector<1x128xf32> -> vector<1x128xf32>
    %217 = arith.addf %215, %216 : vector<1x128xf32>
    %218 = arith.addf %217, %9 : vector<1x128xf32>
    %219 = arith.negf %218 : vector<1x128xf32>
    %220 = math.exp %219 : vector<1x128xf32>
    %cst_47 = arith.constant 1.000000e+00 : f32
    %221 = vector.broadcast %cst_47 : f32 to vector<1x128xf32>
    %222 = arith.addf %221, %220 : vector<1x128xf32>
    %223 = arith.divf %221, %222 : vector<1x128xf32>
    %224 = vector.extract_strided_slice %223 {offsets = [0, 0], sizes = [1, 32], strides = [1, 1]} : vector<1x128xf32> to vector<1x32xf32>
    %225 = vector.extract_strided_slice %223 {offsets = [0, 32], sizes = [1, 32], strides = [1, 1]} : vector<1x128xf32> to vector<1x32xf32>
    %226 = vector.extract_strided_slice %223 {offsets = [0, 96], sizes = [1, 32], strides = [1, 1]} : vector<1x128xf32> to vector<1x32xf32>
    %227 = vector.extract_strided_slice %218 {offsets = [0, 64], sizes = [1, 32], strides = [1, 1]} : vector<1x128xf32> to vector<1x32xf32>
    %228 = math.tanh %227 : vector<1x32xf32>
    %229 = arith.mulf %225, %194 : vector<1x32xf32>
    %230 = arith.mulf %224, %228 : vector<1x32xf32>
    %231 = arith.addf %229, %230 : vector<1x32xf32>
    %232 = math.tanh %231 : vector<1x32xf32>
    %233 = arith.mulf %226, %232 : vector<1x32xf32>
    %234 = vector.extract_strided_slice %44 {offsets = [5, 0], sizes = [1, 128], strides = [1, 1]} : vector<8x128xf32> to vector<1x128xf32>
    %cst_48 = arith.constant dense<0.000000e+00> : vector<1x128xf32>
    %235 = tpu.matmul %214, %38, %cst_48 {dimension_numbers = #tpu.dot_dimension_numbers<[1], [0], [0], [1], [0, 0, 1, 1], [], []>} : vector<1x32xf32>, vector<32x128xf32>, vector<1x128xf32> -> vector<1x128xf32>
    %236 = arith.addf %234, %235 : vector<1x128xf32>
    %237 = arith.negf %236 : vector<1x128xf32>
    %238 = math.exp %237 : vector<1x128xf32>
    %cst_49 = arith.constant 1.000000e+00 : f32
    %239 = vector.broadcast %cst_49 : f32 to vector<1x128xf32>
    %240 = arith.addf %239, %238 : vector<1x128xf32>
    %241 = arith.divf %239, %240 : vector<1x128xf32>
    %242 = vector.extract_strided_slice %241 {offsets = [0, 0], sizes = [1, 32], strides = [1, 1]} : vector<1x128xf32> to vector<1x32xf32>
    %243 = vector.extract_strided_slice %241 {offsets = [0, 32], sizes = [1, 32], strides = [1, 1]} : vector<1x128xf32> to vector<1x32xf32>
    %244 = vector.extract_strided_slice %241 {offsets = [0, 96], sizes = [1, 32], strides = [1, 1]} : vector<1x128xf32> to vector<1x32xf32>
    %245 = vector.extract_strided_slice %236 {offsets = [0, 64], sizes = [1, 32], strides = [1, 1]} : vector<1x128xf32> to vector<1x32xf32>
    %246 = math.tanh %245 : vector<1x32xf32>
    %247 = arith.mulf %243, %212 : vector<1x32xf32>
    %248 = arith.mulf %242, %246 : vector<1x32xf32>
    %249 = arith.addf %247, %248 : vector<1x32xf32>
    %250 = math.tanh %249 : vector<1x32xf32>
    %251 = arith.mulf %244, %250 : vector<1x32xf32>
    %cst_50 = arith.constant dense<0.000000e+00> : vector<1x128xf32>
    %252 = tpu.matmul %251, %39, %cst_50 {dimension_numbers = #tpu.dot_dimension_numbers<[1], [0], [0], [1], [0, 0, 1, 1], [], []>} : vector<1x32xf32>, vector<32x128xf32>, vector<1x128xf32> -> vector<1x128xf32>
    %cst_51 = arith.constant dense<0.000000e+00> : vector<1x128xf32>
    %253 = tpu.matmul %233, %40, %cst_51 {dimension_numbers = #tpu.dot_dimension_numbers<[1], [0], [0], [1], [0, 0, 1, 1], [], []>} : vector<1x32xf32>, vector<32x128xf32>, vector<1x128xf32> -> vector<1x128xf32>
    %254 = arith.addf %252, %253 : vector<1x128xf32>
    %255 = arith.addf %254, %9 : vector<1x128xf32>
    %256 = arith.negf %255 : vector<1x128xf32>
    %257 = math.exp %256 : vector<1x128xf32>
    %cst_52 = arith.constant 1.000000e+00 : f32
    %258 = vector.broadcast %cst_52 : f32 to vector<1x128xf32>
    %259 = arith.addf %258, %257 : vector<1x128xf32>
    %260 = arith.divf %258, %259 : vector<1x128xf32>
    %261 = vector.extract_strided_slice %260 {offsets = [0, 0], sizes = [1, 32], strides = [1, 1]} : vector<1x128xf32> to vector<1x32xf32>
    %262 = vector.extract_strided_slice %260 {offsets = [0, 32], sizes = [1, 32], strides = [1, 1]} : vector<1x128xf32> to vector<1x32xf32>
    %263 = vector.extract_strided_slice %260 {offsets = [0, 96], sizes = [1, 32], strides = [1, 1]} : vector<1x128xf32> to vector<1x32xf32>
    %264 = vector.extract_strided_slice %255 {offsets = [0, 64], sizes = [1, 32], strides = [1, 1]} : vector<1x128xf32> to vector<1x32xf32>
    %265 = math.tanh %264 : vector<1x32xf32>
    %266 = arith.mulf %262, %231 : vector<1x32xf32>
    %267 = arith.mulf %261, %265 : vector<1x32xf32>
    %268 = arith.addf %266, %267 : vector<1x32xf32>
    %269 = math.tanh %268 : vector<1x32xf32>
    %270 = arith.mulf %263, %269 : vector<1x32xf32>
    %271 = vector.extract_strided_slice %44 {offsets = [6, 0], sizes = [1, 128], strides = [1, 1]} : vector<8x128xf32> to vector<1x128xf32>
    %cst_53 = arith.constant dense<0.000000e+00> : vector<1x128xf32>
    %272 = tpu.matmul %251, %38, %cst_53 {dimension_numbers = #tpu.dot_dimension_numbers<[1], [0], [0], [1], [0, 0, 1, 1], [], []>} : vector<1x32xf32>, vector<32x128xf32>, vector<1x128xf32> -> vector<1x128xf32>
    %273 = arith.addf %271, %272 : vector<1x128xf32>
    %274 = arith.negf %273 : vector<1x128xf32>
    %275 = math.exp %274 : vector<1x128xf32>
    %cst_54 = arith.constant 1.000000e+00 : f32
    %276 = vector.broadcast %cst_54 : f32 to vector<1x128xf32>
    %277 = arith.addf %276, %275 : vector<1x128xf32>
    %278 = arith.divf %276, %277 : vector<1x128xf32>
    %279 = vector.extract_strided_slice %278 {offsets = [0, 0], sizes = [1, 32], strides = [1, 1]} : vector<1x128xf32> to vector<1x32xf32>
    %280 = vector.extract_strided_slice %278 {offsets = [0, 32], sizes = [1, 32], strides = [1, 1]} : vector<1x128xf32> to vector<1x32xf32>
    %281 = vector.extract_strided_slice %278 {offsets = [0, 96], sizes = [1, 32], strides = [1, 1]} : vector<1x128xf32> to vector<1x32xf32>
    %282 = vector.extract_strided_slice %273 {offsets = [0, 64], sizes = [1, 32], strides = [1, 1]} : vector<1x128xf32> to vector<1x32xf32>
    %283 = math.tanh %282 : vector<1x32xf32>
    %284 = arith.mulf %280, %249 : vector<1x32xf32>
    %285 = arith.mulf %279, %283 : vector<1x32xf32>
    %286 = arith.addf %284, %285 : vector<1x32xf32>
    %287 = math.tanh %286 : vector<1x32xf32>
    %288 = arith.mulf %281, %287 : vector<1x32xf32>
    %cst_55 = arith.constant dense<0.000000e+00> : vector<1x128xf32>
    %289 = tpu.matmul %288, %39, %cst_55 {dimension_numbers = #tpu.dot_dimension_numbers<[1], [0], [0], [1], [0, 0, 1, 1], [], []>} : vector<1x32xf32>, vector<32x128xf32>, vector<1x128xf32> -> vector<1x128xf32>
    %cst_56 = arith.constant dense<0.000000e+00> : vector<1x128xf32>
    %290 = tpu.matmul %270, %40, %cst_56 {dimension_numbers = #tpu.dot_dimension_numbers<[1], [0], [0], [1], [0, 0, 1, 1], [], []>} : vector<1x32xf32>, vector<32x128xf32>, vector<1x128xf32> -> vector<1x128xf32>
    %291 = arith.addf %289, %290 : vector<1x128xf32>
    %292 = arith.addf %291, %9 : vector<1x128xf32>
    %293 = arith.negf %292 : vector<1x128xf32>
    %294 = math.exp %293 : vector<1x128xf32>
    %cst_57 = arith.constant 1.000000e+00 : f32
    %295 = vector.broadcast %cst_57 : f32 to vector<1x128xf32>
    %296 = arith.addf %295, %294 : vector<1x128xf32>
    %297 = arith.divf %295, %296 : vector<1x128xf32>
    %298 = vector.extract_strided_slice %297 {offsets = [0, 0], sizes = [1, 32], strides = [1, 1]} : vector<1x128xf32> to vector<1x32xf32>
    %299 = vector.extract_strided_slice %297 {offsets = [0, 32], sizes = [1, 32], strides = [1, 1]} : vector<1x128xf32> to vector<1x32xf32>
    %300 = vector.extract_strided_slice %297 {offsets = [0, 96], sizes = [1, 32], strides = [1, 1]} : vector<1x128xf32> to vector<1x32xf32>
    %301 = vector.extract_strided_slice %292 {offsets = [0, 64], sizes = [1, 32], strides = [1, 1]} : vector<1x128xf32> to vector<1x32xf32>
    %302 = math.tanh %301 : vector<1x32xf32>
    %303 = arith.mulf %299, %268 : vector<1x32xf32>
    %304 = arith.mulf %298, %302 : vector<1x32xf32>
    %305 = arith.addf %303, %304 : vector<1x32xf32>
    %306 = math.tanh %305 : vector<1x32xf32>
    %307 = arith.mulf %300, %306 : vector<1x32xf32>
    %308 = vector.extract_strided_slice %44 {offsets = [7, 0], sizes = [1, 128], strides = [1, 1]} : vector<8x128xf32> to vector<1x128xf32>
    %cst_58 = arith.constant dense<0.000000e+00> : vector<1x128xf32>
    %309 = tpu.matmul %288, %38, %cst_58 {dimension_numbers = #tpu.dot_dimension_numbers<[1], [0], [0], [1], [0, 0, 1, 1], [], []>} : vector<1x32xf32>, vector<32x128xf32>, vector<1x128xf32> -> vector<1x128xf32>
    %310 = arith.addf %308, %309 : vector<1x128xf32>
    %311 = arith.negf %310 : vector<1x128xf32>
    %312 = math.exp %311 : vector<1x128xf32>
    %cst_59 = arith.constant 1.000000e+00 : f32
    %313 = vector.broadcast %cst_59 : f32 to vector<1x128xf32>
    %314 = arith.addf %313, %312 : vector<1x128xf32>
    %315 = arith.divf %313, %314 : vector<1x128xf32>
    %316 = vector.extract_strided_slice %315 {offsets = [0, 0], sizes = [1, 32], strides = [1, 1]} : vector<1x128xf32> to vector<1x32xf32>
    %317 = vector.extract_strided_slice %315 {offsets = [0, 32], sizes = [1, 32], strides = [1, 1]} : vector<1x128xf32> to vector<1x32xf32>
    %318 = vector.extract_strided_slice %315 {offsets = [0, 96], sizes = [1, 32], strides = [1, 1]} : vector<1x128xf32> to vector<1x32xf32>
    %319 = vector.extract_strided_slice %310 {offsets = [0, 64], sizes = [1, 32], strides = [1, 1]} : vector<1x128xf32> to vector<1x32xf32>
    %320 = math.tanh %319 : vector<1x32xf32>
    %321 = arith.mulf %317, %286 : vector<1x32xf32>
    %322 = arith.mulf %316, %320 : vector<1x32xf32>
    %323 = arith.addf %321, %322 : vector<1x32xf32>
    %324 = math.tanh %323 : vector<1x32xf32>
    %325 = arith.mulf %318, %324 : vector<1x32xf32>
    %cst_60 = arith.constant dense<0.000000e+00> : vector<1x128xf32>
    %326 = tpu.matmul %325, %39, %cst_60 {dimension_numbers = #tpu.dot_dimension_numbers<[1], [0], [0], [1], [0, 0, 1, 1], [], []>} : vector<1x32xf32>, vector<32x128xf32>, vector<1x128xf32> -> vector<1x128xf32>
    %cst_61 = arith.constant dense<0.000000e+00> : vector<1x128xf32>
    %327 = tpu.matmul %307, %40, %cst_61 {dimension_numbers = #tpu.dot_dimension_numbers<[1], [0], [0], [1], [0, 0, 1, 1], [], []>} : vector<1x32xf32>, vector<32x128xf32>, vector<1x128xf32> -> vector<1x128xf32>
    %328 = arith.addf %326, %327 : vector<1x128xf32>
    %329 = arith.addf %328, %9 : vector<1x128xf32>
    %330 = arith.negf %329 : vector<1x128xf32>
    %331 = math.exp %330 : vector<1x128xf32>
    %cst_62 = arith.constant 1.000000e+00 : f32
    %332 = vector.broadcast %cst_62 : f32 to vector<1x128xf32>
    %333 = arith.addf %332, %331 : vector<1x128xf32>
    %334 = arith.divf %332, %333 : vector<1x128xf32>
    %335 = vector.extract_strided_slice %334 {offsets = [0, 0], sizes = [1, 32], strides = [1, 1]} : vector<1x128xf32> to vector<1x32xf32>
    %336 = vector.extract_strided_slice %334 {offsets = [0, 32], sizes = [1, 32], strides = [1, 1]} : vector<1x128xf32> to vector<1x32xf32>
    %337 = vector.extract_strided_slice %334 {offsets = [0, 96], sizes = [1, 32], strides = [1, 1]} : vector<1x128xf32> to vector<1x32xf32>
    %338 = vector.extract_strided_slice %329 {offsets = [0, 64], sizes = [1, 32], strides = [1, 1]} : vector<1x128xf32> to vector<1x32xf32>
    %339 = math.tanh %338 : vector<1x32xf32>
    %340 = arith.mulf %336, %305 : vector<1x32xf32>
    %341 = arith.mulf %335, %339 : vector<1x32xf32>
    %342 = arith.addf %340, %341 : vector<1x32xf32>
    %343 = math.tanh %342 : vector<1x32xf32>
    %344 = arith.mulf %337, %343 : vector<1x32xf32>
    %cst_63 = arith.constant dense<0.000000e+00> : vector<1x128xf32>
    %345 = tpu.matmul %344, %41, %cst_63 {dimension_numbers = #tpu.dot_dimension_numbers<[1], [0], [0], [1], [0, 0, 1, 1], [], []>} : vector<1x32xf32>, vector<32x128xf32>, vector<1x128xf32> -> vector<1x128xf32>
    %346 = arith.addf %345, %10 : vector<1x128xf32>
    %c0_64 = arith.constant 0 : index
    %c0_65 = arith.constant 0 : index
    %347 = vector.load %arg5[%c0_64, %c0_65] : memref<1x128xf32, #tpu.memory_space<vmem>>, vector<1x128xf32>
    tpu.vector_store %arg5[%c0_64, %c0_65], %346 {strides = array<i32>} : memref<1x128xf32, #tpu.memory_space<vmem>>, vector<1x128xf32>,
    return
  }
}

</mosaic_0001>

<bundles_post_ra>
// kernel: tgcn_forward.1
= control target key start
LH: loop header
LB: loop body
LE: loop exit
PB: predicated region body
PF: predicated region fallthrough
CT: control target
= control target key end

     0   :  { %vm59_vm0 = vcmask 64512   ;;  %s2643_s0 = inlined_call_operand.vmem [shape: f32[128,128], index: 0, kind: input, shape index: {}]   ;;  %s2644_s1 = inlined_call_operand.vmem [shape: f32[128,8], index: 1, kind: input, shape index: {}]   ;;  %s2645_s2 = inlined_call_operand.vmem [shape: f32[40,32], index: 2, kind: input, shape index: {}]   ;;  %s2646_s3 = inlined_call_operand.vmem [shape: f32[160,128], index: 3, kind: input, shape index: {}]   ;;  %s2647_s4 = inlined_call_operand.vmem [shape: f32[5,128], index: 4, kind: input, shape index: {}]   ;;  %s2648_s5 = inlined_call_operand.hbm [shape: f32[1,128], index: 5, kind: output, shape index: {}]  }
   0x1   :  { %v53_v0 = vld [vmem:[%s2645_s2] sm:$0xff] }
   0x2   :  { %v37_v1 = vld [vmem:[%s2644_s1] sm:$0xff]  ;;  %123 = vmatpush.msra.mxu0 %v53_v0 }
   0x3   :  { %1787 = vmatmul.msk.f32.vlgmr.msra.gmra.mxu0 %vm59_vm0, %v37_v1 }
   0x4   :  { %10 = vsyncpa [#allocation3], 0  ;;  %v38_v2 = vld [vmem:[%s2644_s1 + $0x8] sm:$0xff]  ;;  %v39_v3 = vld [vmem:[%s2644_s1 + $0x10] sm:$0xff]  ;;  %vm255_vm1 = vcmask 261120   ;;  %s2022_s30 = smov 64  }
   0x5   :  { %v40_v4 = vld [vmem:[%s2644_s1 + $0x18] sm:$0xff]  ;;  %v41_v5 = vld [vmem:[%s2644_s1 + $0x20] sm:$0xff]  ;;  %v42_v6 = vld [vmem:[%s2644_s1 + $0x28] sm:$0xff]  ;;  %s2023_s6 = smov 32  }
   0x6   :  { %v43_v7 = vld [vmem:[%s2644_s1 + $0x30] sm:$0xff]  ;;  %v44_v8 = vld [vmem:[%s2644_s1 + $0x38] sm:$0xff]  ;;  %v45_v9 = vld [vmem:[%s2644_s1 + $0x40] sm:$0xff] }
   0x7   :  { %v46_v10 = vld [vmem:[%s2644_s1 + $0x48] sm:$0xff]  ;;  %v47_v11 = vld [vmem:[%s2644_s1 + $0x50] sm:$0xff]  ;;  %v48_v12 = vld [vmem:[%s2644_s1 + $0x58] sm:$0xff] }
   0x8   :  { %v49_v13 = vld [vmem:[%s2644_s1 + $0x60] sm:$0xff]  ;;  %v50_v14 = vld [vmem:[%s2644_s1 + $0x68] sm:$0xff]  ;;  %v51_v15 = vld [vmem:[%s2644_s1 + $0x70] sm:$0xff] }
   0x9   :  { %v52_v16 = vld [vmem:[%s2644_s1 + $0x78] sm:$0xff]  ;;  %v2125_v33 = vld [vmem:[%s2643_s0] sm:$0xff]  ;;  %v2131_v34 = vld [vmem:[%s2643_s0 + $0x8] sm:$0xff] }
   0xa   :  { %v2137_v35 = vld [vmem:[%s2643_s0 + $0x10] sm:$0xff]  ;;  %v2143_v36 = vld [vmem:[%s2643_s0 + $0x18] sm:$0xff]  ;;  %v2149_v37 = vld [vmem:[%s2643_s0 + $0x20] sm:$0xff] }
   0xb   :  { %1788 = vmatmul.msk.f32.gmra.mxu0 %vm59_vm0, %v38_v2  ;;  %v2155_v38 = vld [vmem:[%s2643_s0 + $0x28] sm:$0xff]  ;;  %v2161_v39 = vld [vmem:[%s2643_s0 + $0x30] sm:$0xff]  ;;  %v2167_v40 = vld [vmem:[%s2643_s0 + $0x38] sm:$0xff] }
   0xc   :  { %v2173_v41 = vld [vmem:[%s2643_s0 + $0x40] sm:$0xff]  ;;  %v2179_v42 = vld [vmem:[%s2643_s0 + $0x48] sm:$0xff]  ;;  %v2185_v43 = vld [vmem:[%s2643_s0 + $0x50] sm:$0xff] }
   0xd   :  { %v2191_v44 = vld [vmem:[%s2643_s0 + $0x58] sm:$0xff]  ;;  %v57_v45 = vld [vmem:[%s2645_s2 + $0x20] sm:$0xff]  ;;  %v55_v48 = vld [vmem:[%s2645_s2 + $0x10] sm:$0xff] }
   0xe   :  { %316 = vmatpush.msra.mxu2 %v57_v45  ;;  %v56_v46 = vld [vmem:[%s2645_s2 + $0x18] sm:$0xff]  ;;  %v2203_v47 = vld [vmem:[%s2643_s0 + $0x60] sm:$0xff]  ;;  %v54_v49 = vld [vmem:[%s2645_s2 + $0x8] sm:$0xff] }
   0xf   :  { %v2215_v50 = vld [vmem:[%s2643_s0 + $0x68] sm:$0xff]  ;;  %v2221_v51 = vld [vmem:[%s2643_s0 + $0x70] sm:$0xff]  ;;  %v2227_v52 = vld [vmem:[%s2643_s0 + $0x78] sm:$0xff] }
  0x10   :  { %317 = vmatpush.msra.mxu2 %v56_v46  ;;  %v2232_v53 = vld [vmem:[%s2647_s4] sm:$0x1f] }
  0x11   :  { %v2236_v54 = vperm.slane %v2232_v53, 0 }
  0x12   :  { %318 = vmatpush.msra.mxu2 %v55_v48 }
  0x13   :  { %1789 = vmatmul.msk.f32.gmra.mxu0 %vm59_vm0, %v39_v3 }
  0x14   :  { %319 = vmatpush.msra.mxu2 %v54_v49 }
  0x1b   :  { %1790 = vmatmul.msk.f32.gmra.mxu0 %vm59_vm0, %v40_v4 }
  0x23   :  { %1791 = vmatmul.msk.f32.gmra.mxu0 %vm59_vm0, %v41_v5 }
  0x2b   :  { %1792 = vmatmul.msk.f32.gmra.mxu0 %vm59_vm0, %v42_v6 }
  0x33   :  { %1793 = vmatmul.msk.f32.gmra.mxu0 %vm59_vm0, %v43_v7 }
  0x3b   :  { %1794 = vmatmul.msk.f32.gmra.mxu0 %vm59_vm0, %v44_v8 }
  0x43   :  { %1795 = vmatmul.msk.f32.gmra.mxu0 %vm59_vm0, %v45_v9 }
  0x4b   :  { %1796 = vmatmul.msk.f32.gmra.mxu0 %vm59_vm0, %v46_v10 }
  0x53   :  { %1797 = vmatmul.msk.f32.gmra.mxu0 %vm59_vm0, %v47_v11 }
  0x5b   :  { %1798 = vmatmul.msk.f32.gmra.mxu0 %vm59_vm0, %v48_v12 }
  0x63   :  { %1799 = vmatmul.msk.f32.gmra.mxu0 %vm59_vm0, %v49_v13 }
  0x6b   :  { %1800 = vmatmul.msk.f32.gmra.mxu0 %vm59_vm0, %v50_v14 }
  0x73   :  { %1801 = vmatmul.msk.f32.gmra.mxu0 %vm59_vm0, %v51_v15 }
  0x7b   :  { %1802 = vmatmul.msk.f32.gmra.mxu0 %vm59_vm0, %v52_v16 }
  0x80   :  { %v125_v17 = vpop.f32.mrf.mxu0 }
  0x88   :  { %v128_v18 = vpop.f32.mrf.mxu0 }
  0x90   :  { %v131_v19 = vpop.f32.mrf.mxu0 }
  0x98   :  { %v134_v20 = vpop.f32.mrf.mxu0 }
  0xa0   :  { %v137_v21 = vpop.f32.mrf.mxu0 }
  0xa8   :  { %v140_v22 = vpop.f32.mrf.mxu0 }
  0xb0   :  { %v143_v23 = vpop.f32.mrf.mxu0 }
  0xb8   :  { %v146_v24 = vpop.f32.mrf.mxu0 }
  0xc0   :  { %v149_v25 = vpop.f32.mrf.mxu0 }
  0xc8   :  { %v152_v26 = vpop.f32.mrf.mxu0 }
  0xd0   :  { %v155_v27 = vpop.f32.mrf.mxu0 }
  0xd8   :  { %v158_v28 = vpop.f32.mrf.mxu0 }
  0xe0   :  { %v161_v29 = vpop.f32.mrf.mxu0 }
  0xe8   :  { %v164_v30 = vpop.f32.mrf.mxu0 }
  0xf0   :  { %v167_v31 = vpop.f32.mrf.mxu0 }
  0xf8   :  { %v170_v32 = vpop.f32.mrf.mxu0 }
  0xf9   :  { %174 = vmatpush.msra.mxu1 %v170_v32 }
  0xfb   :  { %175 = vmatpush.msra.mxu1 %v167_v31 }
  0xfd   :  { %176 = vmatpush.msra.mxu1 %v164_v30 }
  0xff   :  { %177 = vmatpush.msra.mxu1 %v161_v29 }
 0x101   :  { %178 = vmatpush.msra.mxu1 %v158_v28 }
 0x103   :  { %179 = vmatpush.msra.mxu1 %v155_v27 }
 0x105   :  { %180 = vmatpush.msra.mxu1 %v152_v26 }
 0x107   :  { %181 = vmatpush.msra.mxu1 %v149_v25 }
 0x109   :  { %182 = vmatpush.msra.mxu1 %v146_v24 }
 0x10b   :  { %183 = vmatpush.msra.mxu1 %v143_v23 }
 0x10d   :  { %184 = vmatpush.msra.mxu1 %v140_v22 }
 0x10f   :  { %185 = vmatpush.msra.mxu1 %v137_v21 }
 0x111   :  { %186 = vmatpush.msra.mxu1 %v134_v20 }
 0x113   :  { %187 = vmatpush.msra.mxu1 %v131_v19 }
 0x115   :  { %188 = vmatpush.msra.mxu1 %v128_v18 }
 0x117   :  { %189 = vmatpush.msra.mxu1 %v125_v17 }
 0x118   :  { %190 = vmatmul.f32.vlgmr.msra.gmra.mxu1 %v2125_v33 }
 0x120   :  { %193 = vmatmul.f32.gmra.mxu1 %v2131_v34 }
 0x128   :  { %196 = vmatmul.f32.gmra.mxu1 %v2137_v35 }
 0x130   :  { %199 = vmatmul.f32.gmra.mxu1 %v2143_v36 }
 0x138   :  { %202 = vmatmul.f32.gmra.mxu1 %v2149_v37 }
 0x140   :  { %205 = vmatmul.f32.gmra.mxu1 %v2155_v38 }
 0x148   :  { %208 = vmatmul.f32.gmra.mxu1 %v2161_v39 }
 0x150   :  { %211 = vmatmul.f32.gmra.mxu1 %v2167_v40 }
 0x158   :  { %214 = vmatmul.f32.gmra.mxu1 %v2173_v41 }
 0x160   :  { %217 = vmatmul.f32.gmra.mxu1 %v2179_v42 }
 0x168   :  { %220 = vmatmul.f32.gmra.mxu1 %v2185_v43 }
 0x170   :  { %223 = vmatmul.f32.gmra.mxu1 %v2191_v44 }
 0x178   :  { %226 = vmatmul.f32.gmra.mxu1 %v2203_v47 }
 0x180   :  { %229 = vmatmul.f32.gmra.mxu1 %v2215_v50 }
 0x188   :  { %232 = vmatmul.f32.gmra.mxu1 %v2221_v51 }
 0x190   :  { %235 = vmatmul.f32.gmra.mxu1 %v2227_v52 }
 0x195   :  { %v191_v55 = vpop.f32.mrf.mxu1 }
 0x196   :  { %v192_v56 = vadd.f32 %v191_v55, %v2236_v54 }
 0x198   :  { %v239_v57 = vmax.f32 %v192_v56, 0.0 }
 0x19a   :  { %1803 = vmatmul.msk.f32.vlgmr.msra.gmra.mxu2 %vm255_vm1, %v239_v57 }
 0x19d   :  { %v194_v58 = vpop.f32.mrf.mxu1 }
 0x19e   :  { %v195_v59 = vadd.f32 %v194_v58, %v2236_v54 }
 0x1a0   :  { %v240_v60 = vmax.f32 %v195_v59, 0.0 }
 0x1a2   :  { %1804 = vmatmul.msk.f32.gmra.mxu2 %vm255_vm1, %v240_v60 }
 0x1a5   :  { %v197_v61 = vpop.f32.mrf.mxu1 }
 0x1a6   :  { %v198_v62 = vadd.f32 %v197_v61, %v2236_v54 }
 0x1a8   :  { %v241_v63 = vmax.f32 %v198_v62, 0.0 }
 0x1aa   :  { %1805 = vmatmul.msk.f32.gmra.mxu2 %vm255_vm1, %v241_v63 }
 0x1ad   :  { %v200_v0 = vpop.f32.mrf.mxu1 }
 0x1ae   :  { %v201_v1 = vadd.f32 %v200_v0, %v2236_v54 }
 0x1b0   :  { %v242_v2 = vmax.f32 %v201_v1, 0.0 }
 0x1b2   :  { %1806 = vmatmul.msk.f32.gmra.mxu2 %vm255_vm1, %v242_v2 }
 0x1b5   :  { %v203_v3 = vpop.f32.mrf.mxu1 }
 0x1b6   :  { %v204_v4 = vadd.f32 %v203_v3, %v2236_v54 }
 0x1b8   :  { %v243_v5 = vmax.f32 %v204_v4, 0.0 }
 0x1ba   :  { %1807 = vmatmul.msk.f32.gmra.mxu2 %vm255_vm1, %v243_v5 }
 0x1bd   :  { %v206_v6 = vpop.f32.mrf.mxu1 }
 0x1be   :  { %v207_v7 = vadd.f32 %v206_v6, %v2236_v54 }
 0x1c0   :  { %v244_v8 = vmax.f32 %v207_v7, 0.0 }
 0x1c2   :  { %1808 = vmatmul.msk.f32.gmra.mxu2 %vm255_vm1, %v244_v8 }
 0x1c5   :  { %v209_v9 = vpop.f32.mrf.mxu1 }
 0x1c6   :  { %v210_v10 = vadd.f32 %v209_v9, %v2236_v54 }
 0x1c8   :  { %v245_v11 = vmax.f32 %v210_v10, 0.0 }
 0x1ca   :  { %1809 = vmatmul.msk.f32.gmra.mxu2 %vm255_vm1, %v245_v11 }
 0x1cd   :  { %v212_v12 = vpop.f32.mrf.mxu1 }
 0x1ce   :  { %v213_v13 = vadd.f32 %v212_v12, %v2236_v54 }
 0x1d0   :  { %v246_v14 = vmax.f32 %v213_v13, 0.0  ;;  %v484_v13 = vld [vmem:[%s2646_s3 + $0x18] sm:$0xff] }
 0x1d1   :  { %517 = vmatpush.msrb.mxu2 %v484_v13 }
 0x1d2   :  { %1810 = vmatmul.msk.f32.gmra.mxu2 %vm255_vm1, %v246_v14  ;;  %v483_v14 = vld [vmem:[%s2646_s3 + $0x10] sm:$0xff] }
 0x1d3   :  { %518 = vmatpush.msrb.mxu2 %v483_v14 }
 0x1d5   :  { %v215_v15 = vpop.f32.mrf.mxu1 }
 0x1d6   :  { %v216_v16 = vadd.f32 %v215_v15, %v2236_v54 }
 0x1d8   :  { %v247_v17 = vmax.f32 %v216_v16, 0.0 }
 0x1da   :  { %1811 = vmatmul.msk.f32.gmra.mxu2 %vm255_vm1, %v247_v17  ;;  %v482_v17 = vld [vmem:[%s2646_s3 + $0x8] sm:$0xff] }
 0x1db   :  { %519 = vmatpush.msrb.mxu2 %v482_v17 }
 0x1dd   :  { %v218_v18 = vpop.f32.mrf.mxu1 }
 0x1de   :  { %v219_v19 = vadd.f32 %v218_v18, %v2236_v54 }
 0x1e0   :  { %v248_v20 = vmax.f32 %v219_v19, 0.0 }
 0x1e2   :  { %1812 = vmatmul.msk.f32.gmra.mxu2 %vm255_vm1, %v248_v20 }
 0x1e5   :  { %v221_v21 = vpop.f32.mrf.mxu1 }
 0x1e6   :  { %v222_v22 = vadd.f32 %v221_v21, %v2236_v54 }
 0x1e8   :  { %v249_v23 = vmax.f32 %v222_v22, 0.0 }
 0x1ea   :  { %1813 = vmatmul.msk.f32.gmra.mxu2 %vm255_vm1, %v249_v23 }
 0x1ed   :  { %v224_v24 = vpop.f32.mrf.mxu1 }
 0x1ee   :  { %v225_v25 = vadd.f32 %v224_v24, %v2236_v54 }
 0x1f0   :  { %v250_v26 = vmax.f32 %v225_v25, 0.0 }
 0x1f2   :  { %1814 = vmatmul.msk.f32.gmra.mxu2 %vm255_vm1, %v250_v26  ;;  %v451_v26 = vlaneseq }
 0x1f5   :  { %v227_v27 = vpop.f32.mrf.mxu1 }
 0x1f6   :  { %v228_v28 = vadd.f32 %v227_v27, %v2236_v54 }
 0x1f8   :  { %v251_v29 = vmax.f32 %v228_v28, 0.0 }
 0x1fa   :  { %1815 = vmatmul.msk.f32.gmra.mxu2 %vm255_vm1, %v251_v29 }
 0x1fd   :  { %v230_v30 = vpop.f32.mrf.mxu1 }
 0x1fe   :  { %v231_v31 = vadd.f32 %v230_v30, %v2236_v54 }
 0x200   :  { %v252_v32 = vmax.f32 %v231_v31, 0.0  ;;  %v452_v31 = vshrl.u32 %v451_v26, 7 }
 0x202   :  { %1816 = vmatmul.msk.f32.gmra.mxu2 %vm255_vm1, %v252_v32 }
 0x205   :  { %v233_v45 = vpop.f32.mrf.mxu1 }
 0x206   :  { %v234_v46 = vadd.f32 %v233_v45, %v2236_v54 }
 0x208   :  { %v253_v48 = vmax.f32 %v234_v46, 0.0 }
 0x20a   :  { %1817 = vmatmul.msk.f32.gmra.mxu2 %vm255_vm1, %v253_v48 }
 0x20d   :  { %v236_v49 = vpop.f32.mrf.mxu1 }
 0x20e   :  { %v237_v55 = vadd.f32 %v236_v49, %v2236_v54  ;;  %v455_v49 = vmul.u32 16, %v452_v31 }
 0x210   :  { %v254_v56 = vmax.f32 %v237_v55, 0.0 }
 0x212   :  { %1818 = vmatmul.msk.f32.gmra.mxu2 %vm255_vm1, %v254_v56 }
 0x21d   :  { %v321_v57 = vpop.f32.mrf.mxu2 }
 0x225   :  { %v324_v58 = vpop.f32.mrf.mxu2 }
 0x22d   :  { %v327_v59 = vpop.f32.mrf.mxu2 }
 0x235   :  { %v330_v60 = vpop.f32.mrf.mxu2 }
 0x23d   :  { %v333_v61 = vpop.f32.mrf.mxu2 }
 0x245   :  { %v336_v62 = vpop.f32.mrf.mxu2 }
 0x24d   :  { %v339_v63 = vpop.f32.mrf.mxu2 }
 0x255   :  { %v342_v0 = vpop.f32.mrf.mxu2 }
 0x25d   :  { %v345_v1 = vpop.f32.mrf.mxu2 }
 0x265   :  { %v348_v2 = vpop.f32.mrf.mxu2 }
 0x26d   :  { %v351_v3 = vpop.f32.mrf.mxu2 }
 0x275   :  { %v354_v4 = vpop.f32.mrf.mxu2 }
 0x27d   :  { %v357_v5 = vpop.f32.mrf.mxu2 }
 0x285   :  { %v360_v6 = vpop.f32.mrf.mxu2 }
 0x28d   :  { %v363_v7 = vpop.f32.mrf.mxu2 }
 0x295   :  { %v366_v8 = vpop.f32.mrf.mxu2 }
 0x296   :  { %370 = vmatpush.msra.mxu3 %v366_v8  ;;  %v2325_v8 = vld [vmem:[%s2646_s3 + $0x20] sm:$0xff] }
 0x298   :  { %371 = vmatpush.msra.mxu3 %v363_v7  ;;  %v2319_v7 = vld [vmem:[%s2646_s3 + $0x28] sm:$0xff] }
 0x29a   :  { %372 = vmatpush.msra.mxu3 %v360_v6  ;;  %v2313_v6 = vld [vmem:[%s2646_s3 + $0x30] sm:$0xff] }
 0x29c   :  { %373 = vmatpush.msra.mxu3 %v357_v5  ;;  %v2308_v5 = vld [vmem:[%s2646_s3 + $0x38] sm:$0xff] }
 0x29e   :  { %374 = vmatpush.msra.mxu3 %v354_v4  ;;  %v481_v4 = vld [vmem:[%s2646_s3] sm:$0xff] }
 0x29f   :  { %520 = vmatpush.msrb.mxu2 %v481_v4 }
 0x2a0   :  { %375 = vmatpush.msra.mxu3 %v351_v3  ;;  %v2020_v3 = vmov 0.0625  }
 0x2a2   :  { %376 = vmatpush.msra.mxu3 %v348_v2 }
 0x2a4   :  { %377 = vmatpush.msra.mxu3 %v345_v1 }
 0x2a6   :  { %378 = vmatpush.msra.mxu3 %v342_v0 }
 0x2a8   :  { %379 = vmatpush.msra.mxu3 %v339_v63 }
 0x2aa   :  { %380 = vmatpush.msra.mxu3 %v336_v62 }
 0x2ac   :  { %381 = vmatpush.msra.mxu3 %v333_v61 }
 0x2ae   :  { %382 = vmatpush.msra.mxu3 %v330_v60  ;;  %v457_v60 = vadd.s32 16, %v455_v49 }
 0x2b0   :  { %383 = vmatpush.msra.mxu3 %v327_v59  ;;  %v454_v59 = vand.u32 127, %v451_v26  ;;  %v2388_v26 = vld [vmem:[%s2646_s3 + $0x40] sm:$0xff] }
 0x2b2   :  { %384 = vmatpush.msra.mxu3 %v324_v58  ;;  %vm456_vm2 = vcmp.ge.s32.totalorder %v454_v59, %v455_v49  ;;  %vm458_vm3 = vcmp.lt.s32.totalorder %v454_v59, %v457_v60  ;;  %v2431_v49 = vrot.slane %v2232_v53, 3 }
 0x2b3   :  { %vm459_vm4 = vmand %vm456_vm2, %vm458_vm3 }
 0x2b4   :  { %385 = vmatpush.msra.mxu3 %v321_v57 }
 0x2b5   :  { %386 = vmatmul.f32.vlgmr.msra.gmra.mxu3 %v2125_v33 }
 0x2bd   :  { %389 = vmatmul.f32.gmra.mxu3 %v2131_v34 }
 0x2c5   :  { %392 = vmatmul.f32.gmra.mxu3 %v2137_v35 }
 0x2cd   :  { %395 = vmatmul.f32.gmra.mxu3 %v2143_v36 }
 0x2d5   :  { %398 = vmatmul.f32.gmra.mxu3 %v2149_v37 }
 0x2dd   :  { %401 = vmatmul.f32.gmra.mxu3 %v2155_v38 }
 0x2e5   :  { %404 = vmatmul.f32.gmra.mxu3 %v2161_v39 }
 0x2ed   :  { %407 = vmatmul.f32.gmra.mxu3 %v2167_v40 }
 0x2f5   :  { %410 = vmatmul.f32.gmra.mxu3 %v2173_v41 }
 0x2fd   :  { %413 = vmatmul.f32.gmra.mxu3 %v2179_v42 }
 0x305   :  { %416 = vmatmul.f32.gmra.mxu3 %v2185_v43 }
 0x30d   :  { %419 = vmatmul.f32.gmra.mxu3 %v2191_v44 }
 0x315   :  { %422 = vmatmul.f32.gmra.mxu3 %v2203_v47 }
 0x31d   :  { %425 = vmatmul.f32.gmra.mxu3 %v2215_v50 }
 0x325   :  { %428 = vmatmul.f32.gmra.mxu3 %v2221_v51  ;;  %v369_v51 = vperm.slane %v2232_v53, 1 }
 0x32d   :  { %431 = vmatmul.f32.gmra.mxu3 %v2227_v52 }
 0x338   :  { %v2286_v33 = vpop.f32.mrf.mxu3 }
 0x339   :  { %v388_v63 = vadd.f32 %v2286_v33, %v369_v51  ;;  %v2021_v33 = vmov 0.0  }
 0x33b   :  { %v435_v2 = vmax.f32 %v388_v63, 0.0 }
 0x340   :  { %v2288_v34 = vpop.f32.mrf.mxu3 }
 0x341   :  { %v391_v61 = vadd.f32 %v2288_v34, %v369_v51 }
 0x343   :  { %v436_v1 = vmax.f32 %v391_v61, 0.0 }
 0x348   :  { %v393_v35 = vpop.f32.mrf.mxu3 }
 0x349   :  { %v394_v57 = vadd.f32 %v393_v35, %v369_v51  ;;  %v501_v35 = vperm.slane %v2232_v53, 2 }
 0x34b   :  { %v437_v0 = vmax.f32 %v394_v57, 0.0 }
 0x350   :  { %v396_v36 = vpop.f32.mrf.mxu3 }
 0x351   :  { %v397_v55 = vadd.f32 %v396_v36, %v369_v51 }
 0x353   :  { %v438_v62 = vmax.f32 %v397_v55, 0.0 }
 0x358   :  { %v399_v37 = vpop.f32.mrf.mxu3 }
 0x359   :  { %v400_v46 = vadd.f32 %v399_v37, %v369_v51 }
 0x35b   :  { %v439_v58 = vmax.f32 %v400_v46, 0.0 }
 0x360   :  { %v402_v38 = vpop.f32.mrf.mxu3 }
 0x361   :  { %v403_v32 = vadd.f32 %v402_v38, %v369_v51 }
 0x363   :  { %v440_v56 = vmax.f32 %v403_v32, 0.0 }
 0x368   :  { %v405_v39 = vpop.f32.mrf.mxu3 }
 0x369   :  { %v406_v29 = vadd.f32 %v405_v39, %v369_v51 }
 0x36b   :  { %v441_v48 = vmax.f32 %v406_v29, 0.0 }
 0x370   :  { %v408_v40 = vpop.f32.mrf.mxu3 }
 0x371   :  { %v409_v27 = vadd.f32 %v408_v40, %v369_v51 }
 0x373   :  { %v442_v45 = vmax.f32 %v409_v27, 0.0 }
 0x378   :  { %v411_v41 = vpop.f32.mrf.mxu3 }
 0x379   :  { %v412_v24 = vadd.f32 %v411_v41, %v369_v51 }
 0x37b   :  { %v443_v30 = vmax.f32 %v412_v24, 0.0  ;;  %v2374_v24 = vld [vmem:[%s2646_s3 + $0x48] sm:$0xff] }
 0x380   :  { %v414_v42 = vpop.f32.mrf.mxu3 }
 0x381   :  { %v415_v22 = vadd.f32 %v414_v42, %v369_v51 }
 0x383   :  { %v444_v28 = vmax.f32 %v415_v22, 0.0  ;;  %v2360_v22 = vld [vmem:[%s2646_s3 + $0x50] sm:$0xff] }
 0x388   :  { %v417_v43 = vpop.f32.mrf.mxu3 }
 0x389   :  { %v418_v20 = vadd.f32 %v417_v43, %v369_v51 }
 0x38b   :  { %v445_v25 = vmax.f32 %v418_v20, 0.0  ;;  %v2349_v20 = vld [vmem:[%s2646_s3 + $0x70] sm:$0xff] }
 0x390   :  { %v420_v44 = vpop.f32.mrf.mxu3 }
 0x391   :  { %v421_v18 = vadd.f32 %v420_v44, %v369_v51 }
 0x393   :  { %v446_v23 = vmax.f32 %v421_v18, 0.0 }
 0x398   :  { %v423_v47 = vpop.f32.mrf.mxu3 }
 0x399   :  { %v424_v15 = vadd.f32 %v423_v47, %v369_v51 }
 0x39b   :  { %v447_v21 = vmax.f32 %v424_v15, 0.0 }
 0x3a0   :  { %v426_v50 = vpop.f32.mrf.mxu3 }
 0x3a1   :  { %v427_v11 = vadd.f32 %v426_v50, %v369_v51 }
 0x3a3   :  { %v448_v19 = vmax.f32 %v427_v11, 0.0 }
 0x3a8   :  { %v429_v54 = vpop.f32.mrf.mxu3 }
 0x3a9   :  { %v430_v9 = vadd.f32 %v429_v54, %v369_v51 }
 0x3ab   :  { %v449_v16 = vmax.f32 %v430_v9, 0.0 }
 0x3b0   :  { %v432_v52 = vpop.f32.mrf.mxu3 }
 0x3b1   :  { %v433_v10 = vadd.f32 %v432_v52, %v369_v51 }
 0x3b3   :  { %v450_v12 = vmax.f32 %v433_v10, 0.0 }
 0x3b5   :  { %461 = vmatpush.msrb.mxu0 %v450_v12 }
 0x3b7   :  { %462 = vmatpush.msrb.mxu0 %v449_v16 }
 0x3b9   :  { %463 = vmatpush.msrb.mxu0 %v448_v19  ;;  %v2344_v19 = vld [vmem:[%s2646_s3 + $0x78] sm:$0xff] }
 0x3ba   :  { %598 = vmatpush.msra.mxu2 %v2344_v19  ;;  %906 = vmatpush.msrb.mxu3 %v2344_v19 }
 0x3bb   :  { %464 = vmatpush.msrb.mxu0 %v447_v21  ;;  %v2355_v21 = vld [vmem:[%s2646_s3 + $0x58] sm:$0xff] }
 0x3bc   :  { %779 = vmatpush.msrb.mxu1 %v2355_v21  ;;  %599 = vmatpush.msra.mxu2 %v2349_v20 }
 0x3bd   :  { %465 = vmatpush.msrb.mxu0 %v446_v23  ;;  %v2366_v23 = vld [vmem:[%s2646_s3 + $0x68] sm:$0xff]  ;;  %907 = vmatpush.msrb.mxu3 %v2349_v20 }
 0x3be   :  { %780 = vmatpush.msrb.mxu1 %v2360_v22  ;;  %600 = vmatpush.msra.mxu2 %v2366_v23 }
 0x3bf   :  { %466 = vmatpush.msrb.mxu0 %v445_v25  ;;  %v2380_v25 = vld [vmem:[%s2646_s3 + $0x60] sm:$0xff]  ;;  %908 = vmatpush.msrb.mxu3 %v2366_v23 }
 0x3c0   :  { %781 = vmatpush.msrb.mxu1 %v2374_v24  ;;  %601 = vmatpush.msra.mxu2 %v2380_v25 }
 0x3c1   :  { %467 = vmatpush.msrb.mxu0 %v444_v28  ;;  %909 = vmatpush.msrb.mxu3 %v2380_v25 }
 0x3c2   :  { %782 = vmatpush.msrb.mxu1 %v2388_v26 }
 0x3c3   :  { %468 = vmatpush.msrb.mxu0 %v443_v30  ;;  %1085 = vmatpush.msra.mxu3 %v2355_v21 }
 0x3c4   :  { %990 = vmatpush.msra.mxu1 %v2308_v5 }
 0x3c5   :  { %469 = vmatpush.msrb.mxu0 %v442_v45  ;;  %1086 = vmatpush.msra.mxu3 %v2360_v22 }
 0x3c6   :  { %991 = vmatpush.msra.mxu1 %v2313_v6 }
 0x3c7   :  { %470 = vmatpush.msrb.mxu0 %v441_v48  ;;  %1087 = vmatpush.msra.mxu3 %v2374_v24 }
 0x3c8   :  { %992 = vmatpush.msra.mxu1 %v2319_v7 }
 0x3c9   :  { %471 = vmatpush.msrb.mxu0 %v440_v56  ;;  %1088 = vmatpush.msra.mxu3 %v2388_v26 }
 0x3ca   :  { %993 = vmatpush.msra.mxu1 %v2325_v8 }
 0x3cb   :  { %472 = vmatpush.msrb.mxu0 %v439_v58 }
 0x3cd   :  { %473 = vmatpush.msrb.mxu0 %v438_v62 }
 0x3cf   :  { %474 = vmatpush.msrb.mxu0 %v437_v0 }
 0x3d1   :  { %475 = vmatpush.msrb.mxu0 %v436_v1 }
 0x3d3   :  { %476 = vmatpush.msrb.mxu0 %v435_v2 }
 0x3d4   :  { %1819 = vmatmul.msk.f32.vlgmr.msrb.gmra.mxu0 %vm459_vm4, %v2020_v3 }
 0x3d5   :  { %540 = vmatpush.msra.mxu0 %v2308_v5 }
 0x3d7   :  { %541 = vmatpush.msra.mxu0 %v2313_v6 }
 0x3d9   :  { %542 = vmatpush.msra.mxu0 %v2319_v7 }
 0x3db   :  { %543 = vmatpush.msra.mxu0 %v2325_v8 }
 0x3dc   :  { %544 = vmatmul.f32.vlgmr.msra.gmra.mxu0 %v2021_v33 }
 0x3dd   :  { %623 = vmatpush.msrb.mxu0 %v2355_v21 }
 0x3df   :  { %624 = vmatpush.msrb.mxu0 %v2360_v22 }
 0x3e1   :  { %625 = vmatpush.msrb.mxu0 %v2374_v24 }
 0x3e3   :  { %626 = vmatpush.msrb.mxu0 %v2388_v26 }
 0x3e5   :  { %753 = vmatpush.msra.mxu0 %v2344_v19 }
 0x3e7   :  { %754 = vmatpush.msra.mxu0 %v2349_v20 }
 0x3e9   :  { %755 = vmatpush.msra.mxu0 %v2366_v23 }
 0x3eb   :  { %756 = vmatpush.msra.mxu0 %v2380_v25 }
 0x451   :  { %v478_v34 = vpop.f32.mrf.mxu0 }
 0x452   :  { %1820 = vmatmul.msk.f32.vlgmr.msrb.gmra.mxu2 %vm255_vm1, %v478_v34 }
 0x453   :  { %684 = vmatpush.msrb.mxu2 %v2308_v5 }
 0x455   :  { %685 = vmatpush.msrb.mxu2 %v2313_v6 }
 0x457   :  { %686 = vmatpush.msrb.mxu2 %v2319_v7 }
 0x459   :  { %v545_v37 = vpop.f32.mrf.mxu0  ;;  %687 = vmatpush.msrb.mxu2 %v2325_v8 }
 0x45a   :  { %602 = vmatmul.f32.vlgmr.msra.gmra.mxu2 %v2021_v33 }
 0x45b   :  { %837 = vmatpush.msra.mxu2 %v2308_v5 }
 0x45d   :  { %838 = vmatpush.msra.mxu2 %v2313_v6 }
 0x45f   :  { %839 = vmatpush.msra.mxu2 %v2319_v7 }
 0x461   :  { %840 = vmatpush.msra.mxu2 %v2325_v8 }
 0x4d5   :  { %v522_v36 = vpop.f32.mrf.mxu2 }
 0x4d6   :  { %v2332_v38 = vadd.f32 %v522_v36, %v501_v35 }
 0x4d8   :  { %v548_v39 = vadd.f32 %v545_v37, %v2332_v38 }
 0x4da   :  { %1865 = vtanh.f32 %v548_v39  ;;  %v1821_v41 = vmul.f32 -1.442695, %v548_v39 }
 0x4dc   :  { %1867 = vpow2.f32 %v1821_v41 }
 0x4dd   :  { %v603_v30 = vpop.f32.mrf.mxu2 }
 0x4e0   :  { %v1866_v40 = vpop.eup %1865 }
 0x4e1   :  { %571 = vrot.lane.b32.xlu0 %v1866_v40, %s2022_s30 }
 0x4e2   :  { %v1868_v42 = vpop.eup %1867 }
 0x4e3   :  { %v552_v43 = vadd.f32 1.0, %v1868_v42 }
 0x4e5   :  { %1869 = vrcp.f32 %v552_v43  ;;  %v564_v52 = vand.u32 2147483648, %v552_v43  ;;  %vm558_vm6 = vweird.f32 %v552_v43  ;;  %v562_v9 = vand.u32 2147483647, %v552_v43 }
 0x4e7   :  { %v565_v11 = vor.u32 1.1754944e-38, %v564_v52  ;;  %vm563_vm8 = vcmp.eq.f32.partialorder %v562_v9, 8.507059e+37 }
 0x4eb   :  { %v1870_v44 = vpop.eup %1869 }
 0x4ec   :  { %v554_v47 = vmul.f32 %v1870_v44, %v552_v43  ;;  %vm559_vm5 = vweird.f32 %v1870_v44 }
 0x4ed   :  { %vm560_vm7 = vmor %vm558_vm6, %vm559_vm5 }
 0x4ee   :  { %v555_v50 = vsub.f32 1.0, %v554_v47 }
 0x4f0   :  { %v556_v54 = vmul.f32 %v1870_v44, %v555_v50 }
 0x4f2   :  { %v557_v51 = vadd.f32 %v1870_v44, %v556_v54 }
 0x4f4   :  { %v561_v10 = vsel %vm560_vm7, %v1870_v44, %v557_v51 }
 0x4f5   :  { %v566_v13 = vsel %vm563_vm8, %v565_v11, %v561_v10 }
 0x4f6   :  { %v569_v15 = vmul.f32 0.0, %v566_v13 }
 0x553   :  { %v572_v12 = vpop.permute.xlu0 %571 }
 0x554   :  { %v574_v14 = vmul.f32 %v572_v12, %v566_v13 }
 0x556   :  { %576 = vrot.lane.b32.xlu0 %v574_v14, %s2023_s6 }
 0x5c8   :  { %v577_v16 = vpop.permute.xlu0 %576 }
 0x5c9   :  { %v2337_v17 = vadd.f32 %v577_v16, %v569_v15 }
 0x5cb   :  { %1871 = vtanh.f32 %v2337_v17  ;;  %v717_v11 = vrot.slane %v2337_v17, 7 }
 0x5d1   :  { %v1872_v18 = vpop.eup %1871 }
 0x5d2   :  { %582 = vrot.lane.b32.xlu1 %v1872_v18, %s2022_s30 }
 0x644   :  { %v583_v27 = vpop.permute.xlu1 %582 }
 0x645   :  { %v585_v28 = vmul.f32 %v583_v27, %v566_v13 }
 0x647   :  { %607 = vrot.lane.b32.xlu1 %v585_v28, %s2023_s6 }
 0x6b9   :  { %v608_v29 = vpop.permute.xlu1 %607 }
 0x6ba   :  { %1822 = vmatmul.msk.f32.vlgmr.msrb.gmra.mxu0 %vm255_vm1, %v608_v29  ;;  %1824 = vmatmul.msk.f32.vlgmr.msrb.gmra.mxu2 %vm255_vm1, %v608_v29 }
 0x6bb   :  { %932 = vmatpush.msrb.mxu0 %v2355_v21  ;;  %1059 = vmatpush.msrb.mxu2 %v2344_v19 }
 0x6bd   :  { %933 = vmatpush.msrb.mxu0 %v2360_v22  ;;  %1060 = vmatpush.msrb.mxu2 %v2349_v20 }
 0x6bf   :  { %934 = vmatpush.msrb.mxu0 %v2374_v24  ;;  %1061 = vmatpush.msrb.mxu2 %v2366_v23 }
 0x6c1   :  { %935 = vmatpush.msrb.mxu0 %v2388_v26  ;;  %1062 = vmatpush.msrb.mxu2 %v2380_v25 }
 0x737   :  { %v628_v45 = vpop.f32.mrf.mxu0 }
 0x738   :  { %v629_v48 = vadd.f32 %v628_v45, %v603_v30 }
 0x73a   :  { %v634_v55 = vadd.f32 %v2431_v49, %v629_v48 }
 0x73c   :  { %v1823_v59 = vmul.f32 -1.442695, %v634_v55 }
 0x73d   :  { %v689_v31 = vpop.f32.mrf.mxu2 }
 0x73e   :  { %v693_v32 = vrot.slane %v689_v31, 7 }
 0x740   :  { %v695_v46 = vadd.f32 %v693_v32, %v2332_v38 }
 0x742   :  { %1873 = vtanh.f32 %v695_v46  ;;  %v1825_v58 = vmul.f32 -1.442695, %v695_v46 }
 0x743   :  { %1875 = vtanh.f32 %v634_v55 }
 0x744   :  { %1877 = vpow2.f32 %v1825_v58 }
 0x745   :  { %1879 = vpow2.f32 %v1823_v59 }
 0x748   :  { %v1874_v56 = vpop.eup %1873 }
 0x749   :  { %721 = vrot.lane.b32.xlu2 %v1874_v56, %s2022_s30  ;;  %v1876_v57 = vpop.eup %1875 }
 0x74a   :  { %v1878_v60 = vpop.eup %1877 }
 0x74b   :  { %v699_v61 = vadd.f32 1.0, %v1878_v60  ;;  %v1880_v62 = vpop.eup %1879 }
 0x74c   :  { %v638_v53 = vadd.f32 1.0, %v1880_v62 }
 0x74d   :  { %1881 = vrcp.f32 %v699_v61  ;;  %v711_v35 = vand.u32 2147483648, %v699_v61  ;;  %vm705_vm10 = vweird.f32 %v699_v61  ;;  %v709_v36 = vand.u32 2147483647, %v699_v61 }
 0x74e   :  { %1883 = vrcp.f32 %v638_v53  ;;  %v650_v47 = vand.u32 2147483648, %v638_v53  ;;  %vm644_vm14 = vweird.f32 %v638_v53  ;;  %v648_v50 = vand.u32 2147483647, %v638_v53 }
 0x74f   :  { %v712_v40 = vor.u32 1.1754944e-38, %v711_v35  ;;  %vm710_vm12 = vcmp.eq.f32.partialorder %v709_v36, 8.507059e+37 }
 0x750   :  { %v651_v51 = vor.u32 1.1754944e-38, %v650_v47  ;;  %vm649_vm0 = vcmp.eq.f32.partialorder %v648_v50, 8.507059e+37 }
 0x751   :  { %657 = vrot.lane.b32.xlu2 %v1876_v57, %s2022_s30 }
 0x753   :  { %v1882_v63 = vpop.eup %1881 }
 0x754   :  { %v701_v0 = vmul.f32 %v1882_v63, %v699_v61  ;;  %v1884_v2 = vpop.eup %1883  ;;  %vm706_vm9 = vweird.f32 %v1882_v63 }
 0x755   :  { %v640_v4 = vmul.f32 %v1884_v2, %v638_v53  ;;  %vm707_vm11 = vmor %vm705_vm10, %vm706_vm9  ;;  %vm645_vm13 = vweird.f32 %v1884_v2 }
 0x756   :  { %v702_v1 = vsub.f32 1.0, %v701_v0  ;;  %vm646_vm15 = vmor %vm644_vm14, %vm645_vm13 }
 0x757   :  { %v641_v34 = vsub.f32 1.0, %v640_v4 }
 0x758   :  { %v703_v3 = vmul.f32 %v1882_v63, %v702_v1 }
 0x759   :  { %v642_v39 = vmul.f32 %v1884_v2, %v641_v34 }
 0x75a   :  { %v704_v33 = vadd.f32 %v1882_v63, %v703_v3 }
 0x75b   :  { %v643_v44 = vadd.f32 %v1884_v2, %v642_v39 }
 0x75c   :  { %v708_v37 = vsel %vm707_vm11, %v1882_v63, %v704_v33 }
 0x75d   :  { %v713_v42 = vsel %vm710_vm12, %v712_v40, %v708_v37  ;;  %v647_v54 = vsel %vm646_vm15, %v1884_v2, %v643_v44 }
 0x75e   :  { %v652_v9 = vsel %vm649_vm0, %v651_v51, %v647_v54  ;;  %v719_v12 = vmul.f32 %v717_v11, %v713_v42 }
 0x75f   :  { %v655_v15 = vmul.f32 0.0, %v652_v9 }
 0x7a3   :  { %v722_v41 = vpop.permute.xlu2 %721 }
 0x7a4   :  { %v724_v43 = vmul.f32 %v722_v41, %v713_v42 }
 0x7a6   :  { %726 = vrot.lane.b32.xlu0 %v724_v43, %s2023_s6 }
 0x7ab   :  { %v658_v52 = vpop.permute.xlu2 %657 }
 0x7ac   :  { %v660_v10 = vmul.f32 %v658_v52, %v652_v9 }
 0x7ae   :  { %662 = vrot.lane.b32.xlu1 %v660_v10, %s2023_s6 }
 0x818   :  { %v727_v13 = vpop.permute.xlu0 %726 }
 0x819   :  { %v2439_v14 = vadd.f32 %v727_v13, %v719_v12 }
 0x81b   :  { %1885 = vtanh.f32 %v2439_v14 }
 0x820   :  { %v663_v16 = vpop.permute.xlu1 %662 }
 0x821   :  { %v1886_v18 = vpop.eup %1885  ;;  %v2442_v27 = vadd.f32 %v663_v16, %v655_v15 }
 0x822   :  { %732 = vrot.lane.b32.xlu2 %v1886_v18, %s2022_s30  ;;  %v870_v18 = vrot.slane %v2439_v14, 7 }
 0x823   :  { %1887 = vtanh.f32 %v2442_v27 }
 0x829   :  { %v1888_v28 = vpop.eup %1887 }
 0x82a   :  { %668 = vrot.lane.b32.xlu0 %v1888_v28, %s2022_s30 }
 0x87c   :  { %v733_v29 = vpop.permute.xlu2 %732 }
 0x87d   :  { %v735_v17 = vmul.f32 %v733_v29, %v713_v42 }
 0x87f   :  { %v762_v30 = vrot.slane %v735_v17, 1 }
 0x881   :  { %763 = vrot.lane.b32.xlu1 %v762_v30, %s2023_s6 }
 0x89c   :  { %v669_v31 = vpop.permute.xlu0 %668 }
 0x89d   :  { %v671_v32 = vmul.f32 %v669_v31, %v652_v9 }
 0x89f   :  { %737 = vrot.lane.b32.xlu2 %v671_v32, %s2023_s6 }
 0x8f3   :  { %v764_v45 = vpop.permute.xlu1 %763 }
 0x8f4   :  { %1827 = vmatmul.msk.f32.vlgmr.msrb.gmra.mxu1 %vm255_vm1, %v764_v45  ;;  %1829 = vmatmul.msk.f32.vlgmr.msra.gmra.mxu2 %vm255_vm1, %v764_v45 }
 0x8f5   :  { %1238 = vmatpush.msra.mxu2 %v2355_v21  ;;  %1212 = vmatpush.msrb.mxu1 %v2344_v19 }
 0x8f7   :  { %1239 = vmatpush.msra.mxu2 %v2360_v22  ;;  %1213 = vmatpush.msrb.mxu1 %v2349_v20 }
 0x8f9   :  { %v738_v46 = vpop.permute.xlu2 %737  ;;  %1240 = vmatpush.msra.mxu2 %v2374_v24  ;;  %1214 = vmatpush.msrb.mxu1 %v2366_v23 }
 0x8fa   :  { %1826 = vmatmul.msk.f32.vlgmr.msra.gmra.mxu0 %vm255_vm1, %v738_v46 }
 0x8fb   :  { %1143 = vmatpush.msra.mxu0 %v2308_v5  ;;  %1241 = vmatpush.msra.mxu2 %v2388_v26 }
 0x8fc   :  { %1215 = vmatpush.msrb.mxu1 %v2380_v25 }
 0x8fd   :  { %1144 = vmatpush.msra.mxu0 %v2313_v6 }
 0x8ff   :  { %1145 = vmatpush.msra.mxu0 %v2319_v7 }
 0x901   :  { %1146 = vmatpush.msra.mxu0 %v2325_v8 }
 0x971   :  { %v784_v48 = vpop.f32.mrf.mxu1 }
 0x977   :  { %v758_v55 = vpop.f32.mrf.mxu0  ;;  %v842_v56 = vpop.f32.mrf.mxu2 }
 0x978   :  { %v785_v57 = vadd.f32 %v784_v48, %v758_v55  ;;  %v846_v58 = vrot.slane %v842_v56, 6 }
 0x97a   :  { %v787_v59 = vadd.f32 %v785_v57, %v2431_v49  ;;  %v848_v60 = vadd.f32 %v846_v58, %v2332_v38 }
 0x97c   :  { %1889 = vtanh.f32 %v787_v59  ;;  %v1828_v53 = vmul.f32 -1.442695, %v787_v59  ;;  %v1830_v63 = vmul.f32 -1.442695, %v848_v60 }
 0x97d   :  { %1891 = vtanh.f32 %v848_v60 }
 0x97e   :  { %1893 = vpow2.f32 %v1828_v53 }
 0x97f   :  { %1895 = vpow2.f32 %v1830_v63 }
 0x982   :  { %v1890_v61 = vpop.eup %1889 }
 0x983   :  { %v1892_v62 = vpop.eup %1891  ;;  %810 = vrot.lane.b32.xlu1 %v1890_v61, %s2022_s30 }
 0x984   :  { %874 = vrot.lane.b32.xlu0 %v1892_v62, %s2022_s30  ;;  %v1894_v0 = vpop.eup %1893 }
 0x985   :  { %v1896_v1 = vpop.eup %1895  ;;  %v791_v2 = vadd.f32 1.0, %v1894_v0 }
 0x986   :  { %v852_v3 = vadd.f32 1.0, %v1896_v1 }
 0x987   :  { %1897 = vrcp.f32 %v791_v2  ;;  %v803_v42 = vand.u32 2147483648, %v791_v2  ;;  %vm797_vm4 = vweird.f32 %v791_v2  ;;  %v801_v44 = vand.u32 2147483647, %v791_v2 }
 0x988   :  { %1899 = vrcp.f32 %v852_v3  ;;  %v864_v47 = vand.u32 2147483648, %v852_v3  ;;  %vm858_vm6 = vweird.f32 %v852_v3  ;;  %v862_v50 = vand.u32 2147483647, %v852_v3 }
 0x989   :  { %v804_v51 = vor.u32 1.1754944e-38, %v803_v42  ;;  %vm802_vm8 = vcmp.eq.f32.partialorder %v801_v44, 8.507059e+37 }
 0x98a   :  { %v865_v9 = vor.u32 1.1754944e-38, %v864_v47  ;;  %vm863_vm9 = vcmp.eq.f32.partialorder %v862_v50, 8.507059e+37 }
 0x98d   :  { %v1898_v4 = vpop.eup %1897 }
 0x98e   :  { %v1900_v33 = vpop.eup %1899  ;;  %v793_v34 = vmul.f32 %v1898_v4, %v791_v2  ;;  %vm798_vm2 = vweird.f32 %v1898_v4 }
 0x98f   :  { %v854_v35 = vmul.f32 %v1900_v33, %v852_v3  ;;  %vm859_vm3 = vweird.f32 %v1900_v33  ;;  %vm799_vm5 = vmor %vm797_vm4, %vm798_vm2 }
 0x990   :  { %v794_v36 = vsub.f32 1.0, %v793_v34  ;;  %vm860_vm7 = vmor %vm858_vm6, %vm859_vm3 }
 0x991   :  { %v855_v37 = vsub.f32 1.0, %v854_v35 }
 0x992   :  { %v795_v39 = vmul.f32 %v1898_v4, %v794_v36 }
 0x993   :  { %v856_v40 = vmul.f32 %v1900_v33, %v855_v37 }
 0x994   :  { %v796_v41 = vadd.f32 %v1898_v4, %v795_v39 }
 0x995   :  { %v857_v43 = vadd.f32 %v1900_v33, %v856_v40 }
 0x996   :  { %v800_v54 = vsel %vm799_vm5, %v1898_v4, %v796_v41 }
 0x997   :  { %v861_v52 = vsel %vm860_vm7, %v1900_v33, %v857_v43  ;;  %v805_v11 = vsel %vm802_vm8, %v804_v51, %v800_v54 }
 0x998   :  { %v866_v13 = vsel %vm863_vm9, %v865_v9, %v861_v52  ;;  %v808_v31 = vmul.f32 %v805_v11, %v2442_v27 }
 0x999   :  { %v872_v28 = vmul.f32 %v870_v18, %v866_v13 }
 0x9f5   :  { %v811_v10 = vpop.permute.xlu1 %810 }
 0x9f6   :  { %v813_v12 = vmul.f32 %v811_v10, %v805_v11  ;;  %v875_v15 = vpop.permute.xlu0 %874 }
 0x9f7   :  { %v877_v16 = vmul.f32 %v875_v15, %v866_v13 }
 0x9f8   :  { %815 = vrot.lane.b32.xlu0 %v813_v12, %s2023_s6 }
 0x9f9   :  { %879 = vrot.lane.b32.xlu2 %v877_v16, %s2023_s6 }
 0xa53   :  { %v880_v29 = vpop.permute.xlu2 %879 }
 0xa54   :  { %v2471_v17 = vadd.f32 %v880_v29, %v872_v28 }
 0xa56   :  { %1901 = vtanh.f32 %v2471_v17 }
 0xa5c   :  { %v1902_v30 = vpop.eup %1901 }
 0xa5d   :  { %885 = vrot.lane.b32.xlu1 %v1902_v30, %s2022_s30 }
 0xa6a   :  { %v816_v32 = vpop.permute.xlu0 %815 }
 0xa6b   :  { %v2476_v45 = vadd.f32 %v816_v32, %v808_v31  ;;  %v1023_v32 = vrot.slane %v2471_v17, 7 }
 0xa6d   :  { %1903 = vtanh.f32 %v2476_v45 }
 0xa73   :  { %v1904_v46 = vpop.eup %1903 }
 0xa74   :  { %821 = vrot.lane.b32.xlu2 %v1904_v46, %s2022_s30 }
 0xace   :  { %v822_v14 = vpop.permute.xlu2 %821 }
 0xacf   :  { %v886_v48 = vpop.permute.xlu1 %885  ;;  %v824_v55 = vmul.f32 %v822_v14, %v805_v11 }
 0xad0   :  { %v888_v56 = vmul.f32 %v886_v48, %v866_v13 }
 0xad1   :  { %890 = vrot.lane.b32.xlu1 %v824_v55, %s2023_s6 }
 0xad2   :  { %v915_v57 = vrot.slane %v888_v56, 2 }
 0xad4   :  { %916 = vrot.lane.b32.xlu0 %v915_v57, %s2023_s6 }
 0xb43   :  { %v891_v58 = vpop.permute.xlu1 %890 }
 0xb44   :  { %1831 = vmatmul.msk.f32.vlgmr.msrb.gmra.mxu3 %vm255_vm1, %v891_v58 }
 0xb45   :  { %1296 = vmatpush.msrb.mxu3 %v2308_v5 }
 0xb46   :  { %v917_v27 = vpop.permute.xlu0 %916 }
 0xb47   :  { %1832 = vmatmul.msk.f32.vlgmr.msrb.gmra.mxu0 %vm255_vm1, %v917_v27  ;;  %1834 = vmatmul.msk.f32.vlgmr.msra.gmra.mxu1 %vm255_vm1, %v917_v27 }
 0xb48   :  { %1297 = vmatpush.msrb.mxu3 %v2313_v6  ;;  %1365 = vmatpush.msrb.mxu0 %v2344_v19 }
 0xb49   :  { %1391 = vmatpush.msra.mxu1 %v2355_v21 }
 0xb4a   :  { %1298 = vmatpush.msrb.mxu3 %v2319_v7  ;;  %1366 = vmatpush.msrb.mxu0 %v2349_v20 }
 0xb4b   :  { %1392 = vmatpush.msra.mxu1 %v2360_v22 }
 0xb4c   :  { %1299 = vmatpush.msrb.mxu3 %v2325_v8  ;;  %1367 = vmatpush.msrb.mxu0 %v2366_v23 }
 0xb4d   :  { %1393 = vmatpush.msra.mxu1 %v2374_v24 }
 0xb4e   :  { %1368 = vmatpush.msrb.mxu0 %v2380_v25 }
 0xb4f   :  { %1394 = vmatpush.msra.mxu1 %v2388_v26 }
 0xbc4   :  { %v995_v59 = vpop.f32.mrf.mxu1  ;;  %v937_v61 = vpop.f32.mrf.mxu0 }
 0xbc5   :  { %v999_v60 = vrot.slane %v995_v59, 5 }
 0xbc7   :  { %v1001_v62 = vadd.f32 %v999_v60, %v2332_v38  ;;  %v911_v53 = vpop.f32.mrf.mxu3 }
 0xbc8   :  { %v938_v63 = vadd.f32 %v937_v61, %v911_v53 }
 0xbc9   :  { %1905 = vtanh.f32 %v1001_v62  ;;  %v1835_v3 = vmul.f32 -1.442695, %v1001_v62 }
 0xbca   :  { %v940_v0 = vadd.f32 %v938_v63, %v2431_v49 }
 0xbcc   :  { %1907 = vtanh.f32 %v940_v0  ;;  %v1833_v36 = vmul.f32 -1.442695, %v940_v0 }
 0xbcd   :  { %1909 = vpow2.f32 %v1835_v3 }
 0xbcf   :  { %v1906_v1 = vpop.eup %1905 }
 0xbd0   :  { %1027 = vrot.lane.b32.xlu2 %v1906_v1, %s2022_s30 }
 0xbd2   :  { %v1908_v2 = vpop.eup %1907 }
 0xbd3   :  { %963 = vrot.lane.b32.xlu0 %v1908_v2, %s2022_s30  ;;  %v1910_v4 = vpop.eup %1909 }
 0xbd4   :  { %v1005_v33 = vadd.f32 1.0, %v1910_v4 }
 0xbd6   :  { %1911 = vrcp.f32 %v1005_v33  ;;  %v1017_v42 = vand.u32 2147483648, %v1005_v33  ;;  %vm1011_vm11 = vweird.f32 %v1005_v33  ;;  %v1015_v44 = vand.u32 2147483647, %v1005_v33 }
 0xbd7   :  { %1913 = vpow2.f32 %v1833_v36 }
 0xbd8   :  { %v1018_v50 = vor.u32 1.1754944e-38, %v1017_v42  ;;  %vm1016_vm13 = vcmp.eq.f32.partialorder %v1015_v44, 8.507059e+37 }
 0xbdc   :  { %v1912_v34 = vpop.eup %1911 }
 0xbdd   :  { %v1007_v35 = vmul.f32 %v1912_v34, %v1005_v33  ;;  %v1914_v40 = vpop.eup %1913  ;;  %vm1012_vm10 = vweird.f32 %v1912_v34 }
 0xbde   :  { %v944_v43 = vadd.f32 1.0, %v1914_v40  ;;  %vm1013_vm12 = vmor %vm1011_vm11, %vm1012_vm10 }
 0xbdf   :  { %v1008_v37 = vsub.f32 1.0, %v1007_v35 }
 0xbe0   :  { %1915 = vrcp.f32 %v944_v43  ;;  %v956_v15 = vand.u32 2147483648, %v944_v43  ;;  %vm950_vm15 = vweird.f32 %v944_v43  ;;  %v954_v16 = vand.u32 2147483647, %v944_v43 }
 0xbe1   :  { %v1009_v39 = vmul.f32 %v1912_v34, %v1008_v37 }
 0xbe2   :  { %v957_v28 = vor.u32 1.1754944e-38, %v956_v15  ;;  %vm955_vm2 = vcmp.eq.f32.partialorder %v954_v16, 8.507059e+37 }
 0xbe3   :  { %v1010_v41 = vadd.f32 %v1912_v34, %v1009_v39 }
 0xbe5   :  { %v1014_v47 = vsel %vm1013_vm12, %v1912_v34, %v1010_v41 }
 0xbe6   :  { %v1019_v51 = vsel %vm1016_vm13, %v1018_v50, %v1014_v47  ;;  %v1916_v9 = vpop.eup %1915 }
 0xbe7   :  { %v946_v10 = vmul.f32 %v1916_v9, %v944_v43  ;;  %vm951_vm14 = vweird.f32 %v1916_v9  ;;  %v1025_v46 = vmul.f32 %v1023_v32, %v1019_v51 }
 0xbe8   :  { %vm952_vm0 = vmor %vm950_vm15, %vm951_vm14 }
 0xbe9   :  { %v947_v11 = vsub.f32 1.0, %v946_v10 }
 0xbeb   :  { %v948_v12 = vmul.f32 %v1916_v9, %v947_v11 }
 0xbed   :  { %v949_v13 = vadd.f32 %v1916_v9, %v948_v12 }
 0xbef   :  { %v953_v18 = vsel %vm952_vm0, %v1916_v9, %v949_v13 }
 0xbf0   :  { %v958_v30 = vsel %vm955_vm2, %v957_v28, %v953_v18 }
 0xbf1   :  { %v961_v55 = vmul.f32 %v958_v30, %v2476_v45 }
 0xc2a   :  { %v1028_v54 = vpop.permute.xlu2 %1027 }
 0xc2b   :  { %v1030_v52 = vmul.f32 %v1028_v54, %v1019_v51 }
 0xc2d   :  { %1032 = vrot.lane.b32.xlu1 %v1030_v52, %s2023_s6 }
 0xc45   :  { %v964_v29 = vpop.permute.xlu0 %963 }
 0xc46   :  { %v966_v31 = vmul.f32 %v964_v29, %v958_v30 }
 0xc48   :  { %968 = vrot.lane.b32.xlu2 %v966_v31, %s2023_s6 }
 0xc9f   :  { %v1033_v14 = vpop.permute.xlu1 %1032 }
 0xca0   :  { %v2504_v48 = vadd.f32 %v1033_v14, %v1025_v46 }
 0xca2   :  { %1917 = vtanh.f32 %v2504_v48  ;;  %v969_v56 = vpop.permute.xlu2 %968 }
 0xca3   :  { %v2508_v57 = vadd.f32 %v969_v56, %v961_v55 }
 0xca5   :  { %1919 = vtanh.f32 %v2508_v57 }
 0xca8   :  { %v1918_v58 = vpop.eup %1917 }
 0xca9   :  { %1038 = vrot.lane.b32.xlu0 %v1918_v58, %s2022_s30  ;;  %v1176_v58 = vrot.slane %v2504_v48, 7 }
 0xcab   :  { %v1920_v27 = vpop.eup %1919 }
 0xcac   :  { %974 = vrot.lane.b32.xlu1 %v1920_v27, %s2022_s30 }
 0xd1b   :  { %v1039_v17 = vpop.permute.xlu0 %1038 }
 0xd1c   :  { %v1041_v59 = vmul.f32 %v1039_v17, %v1019_v51 }
 0xd1e   :  { %v1068_v60 = vrot.slane %v1041_v59, 3  ;;  %v975_v61 = vpop.permute.xlu1 %974 }
 0xd1f   :  { %v977_v62 = vmul.f32 %v975_v61, %v958_v30 }
 0xd20   :  { %1069 = vrot.lane.b32.xlu2 %v1068_v60, %s2023_s6 }
 0xd21   :  { %1043 = vrot.lane.b32.xlu0 %v977_v62, %s2023_s6 }
 0xd7a   :  { %v1070_v45 = vpop.permute.xlu2 %1069 }
 0xd7b   :  { %1837 = vmatmul.msk.f32.vlgmr.msra.gmra.mxu3 %vm255_vm1, %v1070_v45  ;;  %1839 = vmatmul.msk.f32.vlgmr.msra.gmra.mxu0 %vm255_vm1, %v1070_v45 }
 0xd7c   :  { %1518 = vmatpush.msra.mxu3 %v2344_v19  ;;  %1544 = vmatpush.msra.mxu0 %v2355_v21 }
 0xd7e   :  { %1519 = vmatpush.msra.mxu3 %v2349_v20  ;;  %1545 = vmatpush.msra.mxu0 %v2360_v22 }
 0xd80   :  { %1520 = vmatpush.msra.mxu3 %v2366_v23  ;;  %1546 = vmatpush.msra.mxu0 %v2374_v24 }
 0xd82   :  { %1521 = vmatpush.msra.mxu3 %v2380_v25  ;;  %1547 = vmatpush.msra.mxu0 %v2388_v26 }
 0xd93   :  { %v1044_v53 = vpop.permute.xlu0 %1043 }
 0xd94   :  { %1836 = vmatmul.msk.f32.vlgmr.msrb.gmra.mxu2 %vm255_vm1, %v1044_v53 }
 0xd95   :  { %1449 = vmatpush.msrb.mxu2 %v2308_v5 }
 0xd97   :  { %1450 = vmatpush.msrb.mxu2 %v2313_v6 }
 0xd99   :  { %1451 = vmatpush.msrb.mxu2 %v2319_v7 }
 0xd9b   :  { %1452 = vmatpush.msrb.mxu2 %v2325_v8 }
 0xdf8   :  { %v1148_v63 = vpop.f32.mrf.mxu0 }
 0xdf9   :  { %v1152_v0 = vrot.slane %v1148_v63, 4 }
 0xdfb   :  { %v1154_v1 = vadd.f32 %v1152_v0, %v2332_v38 }
 0xdfd   :  { %1921 = vtanh.f32 %v1154_v1  ;;  %v1840_v36 = vmul.f32 -1.442695, %v1154_v1 }
 0xdfe   :  { %v1090_v3 = vpop.f32.mrf.mxu3 }
 0xe03   :  { %v1922_v2 = vpop.eup %1921 }
 0xe04   :  { %1180 = vrot.lane.b32.xlu1 %v1922_v2, %s2022_s30 }
 0xe17   :  { %v1064_v4 = vpop.f32.mrf.mxu2 }
 0xe18   :  { %v1091_v33 = vadd.f32 %v1090_v3, %v1064_v4 }
 0xe1a   :  { %v1093_v34 = vadd.f32 %v1091_v33, %v2431_v49 }
 0xe1c   :  { %1923 = vtanh.f32 %v1093_v34  ;;  %v1838_v37 = vmul.f32 -1.442695, %v1093_v34 }
 0xe1d   :  { %1925 = vpow2.f32 %v1840_v36 }
 0xe1e   :  { %1927 = vpow2.f32 %v1838_v37 }
 0xe22   :  { %v1924_v35 = vpop.eup %1923 }
 0xe23   :  { %1116 = vrot.lane.b32.xlu2 %v1924_v35, %s2022_s30  ;;  %v1926_v39 = vpop.eup %1925 }
 0xe24   :  { %v1158_v40 = vadd.f32 1.0, %v1926_v39  ;;  %v1928_v41 = vpop.eup %1927 }
 0xe25   :  { %v1097_v42 = vadd.f32 1.0, %v1928_v41 }
 0xe26   :  { %1929 = vrcp.f32 %v1158_v40  ;;  %v1170_v10 = vand.u32 2147483648, %v1158_v40  ;;  %vm1164_vm4 = vweird.f32 %v1158_v40  ;;  %v1168_v11 = vand.u32 2147483647, %v1158_v40 }
 0xe27   :  { %1931 = vrcp.f32 %v1097_v42  ;;  %v1109_v30 = vand.u32 2147483648, %v1097_v42  ;;  %vm1103_vm8 = vweird.f32 %v1097_v42  ;;  %v1107_v31 = vand.u32 2147483647, %v1097_v42 }
 0xe28   :  { %v1171_v15 = vor.u32 1.1754944e-38, %v1170_v10  ;;  %vm1169_vm6 = vcmp.eq.f32.partialorder %v1168_v11, 8.507059e+37 }
 0xe29   :  { %v1110_v46 = vor.u32 1.1754944e-38, %v1109_v30  ;;  %vm1108_vm10 = vcmp.eq.f32.partialorder %v1107_v31, 8.507059e+37 }
 0xe2c   :  { %v1930_v43 = vpop.eup %1929 }
 0xe2d   :  { %v1160_v44 = vmul.f32 %v1930_v43, %v1158_v40  ;;  %v1932_v47 = vpop.eup %1931  ;;  %vm1165_vm3 = vweird.f32 %v1930_v43 }
 0xe2e   :  { %v1099_v54 = vmul.f32 %v1932_v47, %v1097_v42  ;;  %vm1166_vm5 = vmor %vm1164_vm4, %vm1165_vm3  ;;  %vm1104_vm7 = vweird.f32 %v1932_v47 }
 0xe2f   :  { %v1161_v50 = vsub.f32 1.0, %v1160_v44  ;;  %vm1105_vm9 = vmor %vm1103_vm8, %vm1104_vm7 }
 0xe30   :  { %v1100_v52 = vsub.f32 1.0, %v1099_v54 }
 0xe31   :  { %v1162_v51 = vmul.f32 %v1930_v43, %v1161_v50 }
 0xe32   :  { %v1101_v12 = vmul.f32 %v1932_v47, %v1100_v52 }
 0xe33   :  { %v1163_v9 = vadd.f32 %v1930_v43, %v1162_v51 }
 0xe34   :  { %v1102_v28 = vadd.f32 %v1932_v47, %v1101_v12 }
 0xe35   :  { %v1167_v13 = vsel %vm1166_vm5, %v1930_v43, %v1163_v9 }
 0xe36   :  { %v1172_v16 = vsel %vm1169_vm6, %v1171_v15, %v1167_v13  ;;  %v1106_v32 = vsel %vm1105_vm9, %v1932_v47, %v1102_v28 }
 0xe37   :  { %v1111_v55 = vsel %vm1108_vm10, %v1110_v46, %v1106_v32  ;;  %v1178_v27 = vmul.f32 %v1176_v58, %v1172_v16 }
 0xe38   :  { %v1114_v60 = vmul.f32 %v1111_v55, %v2508_v57 }
 0xe76   :  { %v1181_v18 = vpop.permute.xlu1 %1180 }
 0xe77   :  { %v1183_v29 = vmul.f32 %v1181_v18, %v1172_v16 }
 0xe79   :  { %1185 = vrot.lane.b32.xlu0 %v1183_v29, %s2023_s6 }
 0xe7d   :  { %v1117_v14 = vpop.permute.xlu2 %1116 }
 0xe7e   :  { %v1119_v56 = vmul.f32 %v1117_v14, %v1111_v55 }
 0xe80   :  { %1121 = vrot.lane.b32.xlu1 %v1119_v56, %s2023_s6 }
 0xeeb   :  { %v1186_v17 = vpop.permute.xlu0 %1185 }
 0xeec   :  { %v2537_v59 = vadd.f32 %v1186_v17, %v1178_v27 }
 0xeee   :  { %1933 = vtanh.f32 %v2537_v59  ;;  %v1329_v30 = vrot.slane %v2537_v59, 7 }
 0xef2   :  { %v1122_v61 = vpop.permute.xlu1 %1121 }
 0xef3   :  { %v2541_v62 = vadd.f32 %v1122_v61, %v1114_v60 }
 0xef4   :  { %v1934_v45 = vpop.eup %1933 }
 0xef5   :  { %1935 = vtanh.f32 %v2541_v62  ;;  %1191 = vrot.lane.b32.xlu2 %v1934_v45, %s2022_s30 }
 0xefb   :  { %v1936_v53 = vpop.eup %1935 }
 0xefc   :  { %1127 = vrot.lane.b32.xlu0 %v1936_v53, %s2022_s30 }
 0xf4f   :  { %v1192_v48 = vpop.permute.xlu2 %1191 }
 0xf50   :  { %v1194_v63 = vmul.f32 %v1192_v48, %v1172_v16 }
 0xf52   :  { %v1221_v0 = vrot.slane %v1194_v63, 4 }
 0xf54   :  { %1222 = vrot.lane.b32.xlu1 %v1221_v0, %s2023_s6 }
 0xf6e   :  { %v1128_v1 = vpop.permute.xlu0 %1127 }
 0xf6f   :  { %v1130_v2 = vmul.f32 %v1128_v1, %v1111_v55 }
 0xf71   :  { %1196 = vrot.lane.b32.xlu2 %v1130_v2, %s2023_s6 }
 0xfc6   :  { %v1223_v57 = vpop.permute.xlu1 %1222 }
 0xfc7   :  { %1842 = vmatmul.msk.f32.vlgmr.msra.gmra.mxu2 %vm255_vm1, %v1223_v57  ;;  %1844 = vmatmul.msk.f32.vlgmr.msrb.gmra.mxu3 %vm255_vm1, %v1223_v57 }
 0xfc8   :  { %1697 = vmatpush.msrb.mxu3 %v2355_v21  ;;  %1671 = vmatpush.msra.mxu2 %v2344_v19 }
 0xfca   :  { %1698 = vmatpush.msrb.mxu3 %v2360_v22  ;;  %1672 = vmatpush.msra.mxu2 %v2349_v20 }
 0xfcb   :  { %v1197_v3 = vpop.permute.xlu2 %1196 }
 0xfcc   :  { %1841 = vmatmul.msk.f32.vlgmr.msrb.gmra.mxu1 %vm255_vm1, %v1197_v3  ;;  %1699 = vmatpush.msrb.mxu3 %v2374_v24 }
 0xfcd   :  { %1602 = vmatpush.msrb.mxu1 %v2308_v5  ;;  %1673 = vmatpush.msra.mxu2 %v2366_v23 }
 0xfce   :  { %1700 = vmatpush.msrb.mxu3 %v2388_v26 }
 0xfcf   :  { %1603 = vmatpush.msrb.mxu1 %v2313_v6  ;;  %1674 = vmatpush.msra.mxu2 %v2380_v25 }
 0xfd1   :  { %1604 = vmatpush.msrb.mxu1 %v2319_v7 }
 0xfd3   :  { %1605 = vmatpush.msrb.mxu1 %v2325_v8 }
0x1049   :  { %v1217_v19 = vpop.f32.mrf.mxu1 }
0x104a   :  { %v1243_v20 = vpop.f32.mrf.mxu2  ;;  %v1301_v21 = vpop.f32.mrf.mxu3 }
0x104b   :  { %v1244_v22 = vadd.f32 %v1243_v20, %v1217_v19  ;;  %v1305_v4 = vrot.slane %v1301_v21, 3 }
0x104d   :  { %v1246_v24 = vadd.f32 %v1244_v22, %v2431_v49  ;;  %v1307_v5 = vadd.f32 %v1305_v4, %v2332_v38 }
0x104f   :  { %1937 = vtanh.f32 %v1246_v24  ;;  %v1843_v6 = vmul.f32 -1.442695, %v1246_v24  ;;  %v1845_v7 = vmul.f32 -1.442695, %v1307_v5 }
0x1050   :  { %1939 = vtanh.f32 %v1307_v5 }
0x1051   :  { %1941 = vpow2.f32 %v1843_v6 }
0x1052   :  { %1943 = vpow2.f32 %v1845_v7 }
0x1055   :  { %v1938_v23 = vpop.eup %1937 }
0x1056   :  { %v1940_v26 = vpop.eup %1939  ;;  %1269 = vrot.lane.b32.xlu1 %v1938_v23, %s2022_s30 }
0x1057   :  { %1333 = vrot.lane.b32.xlu0 %v1940_v26, %s2022_s30  ;;  %v1942_v8 = vpop.eup %1941 }
0x1058   :  { %v1944_v25 = vpop.eup %1943  ;;  %v1250_v33 = vadd.f32 1.0, %v1942_v8 }
0x1059   :  { %v1311_v34 = vadd.f32 1.0, %v1944_v25 }
0x105a   :  { %1945 = vrcp.f32 %v1250_v33  ;;  %v1262_v50 = vand.u32 2147483648, %v1250_v33  ;;  %vm1256_vm13 = vweird.f32 %v1250_v33  ;;  %v1260_v51 = vand.u32 2147483647, %v1250_v33 }
0x105b   :  { %1947 = vrcp.f32 %v1311_v34  ;;  %v1323_v54 = vand.u32 2147483648, %v1311_v34  ;;  %vm1317_vm14 = vweird.f32 %v1311_v34  ;;  %v1321_v52 = vand.u32 2147483647, %v1311_v34 }
0x105c   :  { %v1263_v11 = vor.u32 1.1754944e-38, %v1262_v50  ;;  %vm1261_vm2 = vcmp.eq.f32.partialorder %v1260_v51, 8.507059e+37 }
0x105d   :  { %v1324_v12 = vor.u32 1.1754944e-38, %v1323_v54  ;;  %vm1322_vm3 = vcmp.eq.f32.partialorder %v1321_v52, 8.507059e+37 }
0x1060   :  { %v1946_v35 = vpop.eup %1945 }
0x1061   :  { %v1948_v36 = vpop.eup %1947  ;;  %v1252_v37 = vmul.f32 %v1946_v35, %v1250_v33  ;;  %vm1257_vm11 = vweird.f32 %v1946_v35 }
0x1062   :  { %v1313_v39 = vmul.f32 %v1948_v36, %v1311_v34  ;;  %vm1318_vm12 = vweird.f32 %v1948_v36  ;;  %vm1258_vm15 = vmor %vm1256_vm13, %vm1257_vm11 }
0x1063   :  { %v1253_v40 = vsub.f32 1.0, %v1252_v37  ;;  %vm1319_vm0 = vmor %vm1317_vm14, %vm1318_vm12 }
0x1064   :  { %v1314_v41 = vsub.f32 1.0, %v1313_v39 }
0x1065   :  { %v1254_v42 = vmul.f32 %v1946_v35, %v1253_v40 }
0x1066   :  { %v1315_v43 = vmul.f32 %v1948_v36, %v1314_v41 }
0x1067   :  { %v1255_v44 = vadd.f32 %v1946_v35, %v1254_v42 }
0x1068   :  { %v1316_v47 = vadd.f32 %v1948_v36, %v1315_v43 }
0x1069   :  { %v1259_v9 = vsel %vm1258_vm15, %v1946_v35, %v1255_v44 }
0x106a   :  { %v1320_v10 = vsel %vm1319_vm0, %v1948_v36, %v1316_v47  ;;  %v1264_v15 = vsel %vm1261_vm2, %v1263_v11, %v1259_v9 }
0x106b   :  { %v1325_v18 = vsel %vm1322_vm3, %v1324_v12, %v1320_v10  ;;  %v1267_v55 = vmul.f32 %v1264_v15, %v2541_v62 }
0x106c   :  { %v1331_v31 = vmul.f32 %v1329_v30, %v1325_v18 }
0x10c8   :  { %v1270_v13 = vpop.permute.xlu1 %1269 }
0x10c9   :  { %v1334_v16 = vpop.permute.xlu0 %1333  ;;  %v1272_v28 = vmul.f32 %v1270_v13, %v1264_v15 }
0x10ca   :  { %v1336_v29 = vmul.f32 %v1334_v16, %v1325_v18 }
0x10cb   :  { %1274 = vrot.lane.b32.xlu0 %v1272_v28, %s2023_s6 }
0x10cc   :  { %1338 = vrot.lane.b32.xlu2 %v1336_v29, %s2023_s6 }
0x1126   :  { %v1339_v32 = vpop.permute.xlu2 %1338 }
0x1127   :  { %v2570_v46 = vadd.f32 %v1339_v32, %v1331_v31 }
0x1129   :  { %1949 = vtanh.f32 %v2570_v46  ;;  %v1482_v16 = vrot.slane %v2570_v46, 7 }
0x112f   :  { %v1950_v14 = vpop.eup %1949 }
0x1130   :  { %1344 = vrot.lane.b32.xlu1 %v1950_v14, %s2022_s30 }
0x113d   :  { %v1275_v56 = vpop.permute.xlu0 %1274 }
0x113e   :  { %v2575_v58 = vadd.f32 %v1275_v56, %v1267_v55 }
0x1140   :  { %1951 = vtanh.f32 %v2575_v58 }
0x1146   :  { %v1952_v27 = vpop.eup %1951 }
0x1147   :  { %1280 = vrot.lane.b32.xlu2 %v1952_v27, %s2022_s30 }
0x11a1   :  { %v1281_v17 = vpop.permute.xlu2 %1280 }
0x11a2   :  { %v1345_v59 = vpop.permute.xlu1 %1344  ;;  %v1283_v60 = vmul.f32 %v1281_v17, %v1264_v15 }
0x11a3   :  { %v1347_v61 = vmul.f32 %v1345_v59, %v1325_v18 }
0x11a4   :  { %1349 = vrot.lane.b32.xlu1 %v1283_v60, %s2023_s6 }
0x11a5   :  { %v1374_v45 = vrot.slane %v1347_v61, 5 }
0x11a7   :  { %1375 = vrot.lane.b32.xlu0 %v1374_v45, %s2023_s6 }
0x1216   :  { %v1350_v53 = vpop.permute.xlu1 %1349 }
0x1217   :  { %1846 = vmatmul.msk.f32.vlgmr.msrb.gmra.mxu0 %vm255_vm1, %v1350_v53 }
0x1219   :  { %v1376_v62 = vpop.permute.xlu0 %1375 }
0x121a   :  { %1847 = vmatmul.msk.f32.vlgmr.msra.gmra.mxu1 %vm255_vm1, %v1376_v62  ;;  %1849 = vmatmul.msk.f32.vlgmr.msrb.gmra.mxu2 %vm255_vm1, %v1376_v62 }
0x1294   :  { %v1370_v48 = vpop.f32.mrf.mxu0 }
0x1297   :  { %v1396_v63 = vpop.f32.mrf.mxu1 }
0x1298   :  { %v1397_v0 = vadd.f32 %v1396_v63, %v1370_v48 }
0x129a   :  { %v1399_v1 = vadd.f32 %v1397_v0, %v2431_v49 }
0x129c   :  { %1953 = vtanh.f32 %v1399_v1  ;;  %v1848_v21 = vmul.f32 -1.442695, %v1399_v1 }
0x129d   :  { %v1454_v2 = vpop.f32.mrf.mxu2 }
0x129e   :  { %v1458_v57 = vrot.slane %v1454_v2, 2 }
0x12a0   :  { %v1460_v3 = vadd.f32 %v1458_v57, %v2332_v38 }
0x12a2   :  { %v1954_v19 = vpop.eup %1953  ;;  %1955 = vtanh.f32 %v1460_v3  ;;  %v1850_v23 = vmul.f32 -1.442695, %v1460_v3 }
0x12a3   :  { %1422 = vrot.lane.b32.xlu2 %v1954_v19, %s2022_s30  ;;  %1957 = vpow2.f32 %v1848_v21 }
0x12a8   :  { %v1956_v20 = vpop.eup %1955 }
0x12a9   :  { %1486 = vrot.lane.b32.xlu0 %v1956_v20, %s2022_s30  ;;  %v1958_v22 = vpop.eup %1957 }
0x12aa   :  { %v1403_v4 = vadd.f32 1.0, %v1958_v22 }
0x12ac   :  { %1959 = vrcp.f32 %v1403_v4  ;;  %v1415_v8 = vand.u32 2147483648, %v1403_v4  ;;  %vm1409_vm5 = vweird.f32 %v1403_v4  ;;  %v1413_v33 = vand.u32 2147483647, %v1403_v4 }
0x12ad   :  { %1961 = vpow2.f32 %v1850_v23 }
0x12ae   :  { %v1416_v36 = vor.u32 1.1754944e-38, %v1415_v8  ;;  %vm1414_vm7 = vcmp.eq.f32.partialorder %v1413_v33, 8.507059e+37 }
0x12b2   :  { %v1960_v24 = vpop.eup %1959 }
0x12b3   :  { %v1405_v5 = vmul.f32 %v1960_v24, %v1403_v4  ;;  %vm1410_vm4 = vweird.f32 %v1960_v24  ;;  %v1962_v25 = vpop.eup %1961 }
0x12b4   :  { %vm1411_vm6 = vmor %vm1409_vm5, %vm1410_vm4  ;;  %v1464_v35 = vadd.f32 1.0, %v1962_v25 }
0x12b5   :  { %v1406_v26 = vsub.f32 1.0, %v1405_v5 }
0x12b6   :  { %1963 = vrcp.f32 %v1464_v35  ;;  %v1476_v50 = vand.u32 2147483648, %v1464_v35  ;;  %vm1470_vm9 = vweird.f32 %v1464_v35  ;;  %v1474_v54 = vand.u32 2147483647, %v1464_v35 }
0x12b7   :  { %v1407_v6 = vmul.f32 %v1960_v24, %v1406_v26 }
0x12b8   :  { %v1477_v52 = vor.u32 1.1754944e-38, %v1476_v50  ;;  %vm1475_vm11 = vcmp.eq.f32.partialorder %v1474_v54, 8.507059e+37 }
0x12b9   :  { %v1408_v7 = vadd.f32 %v1960_v24, %v1407_v6 }
0x12bb   :  { %v1412_v34 = vsel %vm1411_vm6, %v1960_v24, %v1408_v7 }
0x12bc   :  { %v1417_v39 = vsel %vm1414_vm7, %v1416_v36, %v1412_v34  ;;  %v1964_v41 = vpop.eup %1963 }
0x12bd   :  { %v1466_v42 = vmul.f32 %v1964_v41, %v1464_v35  ;;  %vm1471_vm8 = vweird.f32 %v1964_v41  ;;  %v1420_v12 = vmul.f32 %v1417_v39, %v2575_v58 }
0x12be   :  { %vm1472_vm10 = vmor %vm1470_vm9, %vm1471_vm8 }
0x12bf   :  { %v1467_v43 = vsub.f32 1.0, %v1466_v42 }
0x12c1   :  { %v1468_v44 = vmul.f32 %v1964_v41, %v1467_v43 }
0x12c3   :  { %v1469_v47 = vadd.f32 %v1964_v41, %v1468_v44 }
0x12c5   :  { %v1473_v51 = vsel %vm1472_vm10, %v1964_v41, %v1469_v47 }
0x12c6   :  { %v1478_v10 = vsel %vm1475_vm11, %v1477_v52, %v1473_v51 }
0x12c7   :  { %v1484_v18 = vmul.f32 %v1482_v16, %v1478_v10 }
0x12fd   :  { %v1423_v37 = vpop.permute.xlu2 %1422 }
0x12fe   :  { %v1425_v40 = vmul.f32 %v1423_v37, %v1417_v39 }
0x1300   :  { %1427 = vrot.lane.b32.xlu1 %v1425_v40, %s2023_s6 }
0x131b   :  { %v1487_v9 = vpop.permute.xlu0 %1486 }
0x131c   :  { %v1489_v11 = vmul.f32 %v1487_v9, %v1478_v10 }
0x131e   :  { %1491 = vrot.lane.b32.xlu2 %v1489_v11, %s2023_s6 }
0x1372   :  { %v1428_v13 = vpop.permute.xlu1 %1427 }
0x1373   :  { %v2591_v15 = vadd.f32 %v1428_v13, %v1420_v12 }
0x1375   :  { %1965 = vtanh.f32 %v2591_v15 }
0x1378   :  { %v1492_v28 = vpop.permute.xlu2 %1491 }
0x1379   :  { %v2595_v29 = vadd.f32 %v1492_v28, %v1484_v18 }
0x137b   :  { %v1966_v30 = vpop.eup %1965  ;;  %1967 = vtanh.f32 %v2595_v29  ;;  %v1635_v52 = vrot.slane %v2595_v29, 7 }
0x137c   :  { %1433 = vrot.lane.b32.xlu0 %v1966_v30, %s2022_s30 }
0x1381   :  { %v1968_v31 = vpop.eup %1967 }
0x1382   :  { %1497 = vrot.lane.b32.xlu1 %v1968_v31, %s2022_s30 }
0x13ee   :  { %v1434_v32 = vpop.permute.xlu0 %1433 }
0x13ef   :  { %v1436_v14 = vmul.f32 %v1434_v32, %v1417_v39 }
0x13f1   :  { %1502 = vrot.lane.b32.xlu2 %v1436_v14, %s2023_s6 }
0x13f4   :  { %v1498_v55 = vpop.permute.xlu1 %1497 }
0x13f5   :  { %v1500_v46 = vmul.f32 %v1498_v55, %v1478_v10 }
0x13f7   :  { %v1527_v56 = vrot.slane %v1500_v46, 6 }
0x13f9   :  { %1528 = vrot.lane.b32.xlu0 %v1527_v56, %s2023_s6 }
0x144b   :  { %v1503_v58 = vpop.permute.xlu2 %1502 }
0x144c   :  { %1851 = vmatmul.msk.f32.vlgmr.msra.gmra.mxu3 %vm255_vm1, %v1503_v58 }
0x146b   :  { %v1529_v27 = vpop.permute.xlu0 %1528 }
0x146c   :  { %1852 = vmatmul.msk.f32.vlgmr.msra.gmra.mxu0 %vm255_vm1, %v1529_v27  ;;  %1854 = vmatmul.msk.f32.vlgmr.msrb.gmra.mxu1 %vm255_vm1, %v1529_v27 }
0x14cf   :  { %v1523_v17 = vpop.f32.mrf.mxu3 }
0x14e9   :  { %v1549_v59 = vpop.f32.mrf.mxu0  ;;  %v1607_v60 = vpop.f32.mrf.mxu1 }
0x14ea   :  { %v1550_v61 = vadd.f32 %v1549_v59, %v1523_v17  ;;  %v1611_v45 = vrot.slane %v1607_v60, 1 }
0x14ec   :  { %v1552_v53 = vadd.f32 %v1550_v61, %v2431_v49  ;;  %v1613_v62 = vadd.f32 %v1611_v45, %v2332_v38 }
0x14ee   :  { %1969 = vtanh.f32 %v1552_v53  ;;  %v1853_v0 = vmul.f32 -1.442695, %v1552_v53  ;;  %v1855_v3 = vmul.f32 -1.442695, %v1613_v62 }
0x14ef   :  { %1971 = vtanh.f32 %v1613_v62 }
0x14f0   :  { %1973 = vpow2.f32 %v1853_v0 }
0x14f4   :  { %v1970_v48 = vpop.eup %1969 }
0x14f5   :  { %v1972_v63 = vpop.eup %1971  ;;  %1575 = vrot.lane.b32.xlu2 %v1970_v48, %s2022_s30 }
0x14f6   :  { %1639 = vrot.lane.b32.xlu1 %v1972_v63, %s2022_s30  ;;  %v1974_v1 = vpop.eup %1973 }
0x14f7   :  { %v1556_v2 = vadd.f32 1.0, %v1974_v1 }
0x14f9   :  { %1975 = vrcp.f32 %v1556_v2  ;;  %v1568_v24 = vand.u32 2147483648, %v1556_v2  ;;  %vm1562_vm13 = vweird.f32 %v1556_v2  ;;  %v1566_v5 = vand.u32 2147483647, %v1556_v2 }
0x14fa   :  { %1977 = vpow2.f32 %v1855_v3 }
0x14fb   :  { %v1569_v26 = vor.u32 1.1754944e-38, %v1568_v24  ;;  %vm1567_vm15 = vcmp.eq.f32.partialorder %v1566_v5, 8.507059e+37 }
0x14ff   :  { %v1976_v57 = vpop.eup %1975 }
0x1500   :  { %v1558_v19 = vmul.f32 %v1976_v57, %v1556_v2  ;;  %v1978_v38 = vpop.eup %1977  ;;  %vm1563_vm12 = vweird.f32 %v1976_v57 }
0x1501   :  { %v1617_v22 = vadd.f32 1.0, %v1978_v38  ;;  %vm1564_vm14 = vmor %vm1562_vm13, %vm1563_vm12  ;;  %v498_v38 = vld [vmem:[%s2646_s3 + $0x88] sm:$0xff] }
0x1502   :  { %v1559_v20 = vsub.f32 1.0, %v1558_v19 }
0x1503   :  { %1979 = vrcp.f32 %v1617_v22  ;;  %v1629_v37 = vand.u32 2147483648, %v1617_v22  ;;  %vm1623_vm2 = vweird.f32 %v1617_v22  ;;  %v1627_v39 = vand.u32 2147483647, %v1617_v22 }
0x1504   :  { %v1560_v21 = vmul.f32 %v1976_v57, %v1559_v20  ;;  %v500_v20 = vld [vmem:[%s2646_s3 + $0x98] sm:$0xff] }
0x1505   :  { %v1630_v41 = vor.u32 1.1754944e-38, %v1629_v37  ;;  %vm1628_vm4 = vcmp.eq.f32.partialorder %v1627_v39, 8.507059e+37  ;;  %1762 = vmatpush.msrb.mxu0 %v500_v20 }
0x1506   :  { %v1561_v4 = vadd.f32 %v1976_v57, %v1560_v21  ;;  %v499_v21 = vld [vmem:[%s2646_s3 + $0x90] sm:$0xff] }
0x1507   :  { %1763 = vmatpush.msrb.mxu0 %v499_v21 }
0x1508   :  { %v1565_v23 = vsel %vm1564_vm14, %v1976_v57, %v1561_v4 }
0x1509   :  { %v1570_v7 = vsel %vm1567_vm15, %v1569_v26, %v1565_v23  ;;  %v1980_v25 = vpop.eup %1979  ;;  %1764 = vmatpush.msrb.mxu0 %v498_v38  ;;  %v1993_v23 = vld [vmem:[%s2647_s4] sm:$0x1f] }
0x150a   :  { %v1619_v33 = vmul.f32 %v1980_v25, %v1617_v22  ;;  %vm1624_vm0 = vweird.f32 %v1980_v25  ;;  %v1573_v47 = vmul.f32 %v1570_v7, %v2591_v15  ;;  %v497_v22 = vld [vmem:[%s2646_s3 + $0x80] sm:$0xff]  ;;  %v1746_v26 = vrot.slane %v1993_v23, 4  ;;  %s1778_s3 = sshll.u32 %s2648_s5, 4  ;;  %s1779_s3 = int_to_ptr.hbm [resolvable:$true] %s1778_s3 }
0x150b   :  { %vm1625_vm3 = vmor %vm1623_vm2, %vm1624_vm0  ;;  %1765 = vmatpush.msrb.mxu0 %v497_v22 }
0x150c   :  { %v1620_v34 = vsub.f32 1.0, %v1619_v33 }
0x150e   :  { %v1621_v35 = vmul.f32 %v1980_v25, %v1620_v34 }
0x1510   :  { %v1622_v36 = vadd.f32 %v1980_v25, %v1621_v35 }
0x1512   :  { %v1626_v40 = vsel %vm1625_vm3, %v1980_v25, %v1622_v36 }
0x1513   :  { %v1631_v43 = vsel %vm1628_vm4, %v1630_v41, %v1626_v40 }
0x1514   :  { %v1637_v9 = vmul.f32 %v1635_v52, %v1631_v43 }
0x154f   :  { %v1576_v6 = vpop.permute.xlu2 %1575 }
0x1550   :  { %v1578_v8 = vmul.f32 %v1576_v6, %v1570_v7 }
0x1552   :  { %1580 = vrot.lane.b32.xlu1 %v1578_v8, %s2023_s6 }
0x1568   :  { %v1640_v42 = vpop.permute.xlu1 %1639 }
0x1569   :  { %v1642_v44 = vmul.f32 %v1640_v42, %v1631_v43 }
0x156b   :  { %1644 = vrot.lane.b32.xlu0 %v1642_v44, %s2023_s6 }
0x15c4   :  { %v1581_v50 = vpop.permute.xlu1 %1580 }
0x15c5   :  { %v1583_v54 = vadd.f32 %v1581_v50, %v1573_v47 }
0x15c7   :  { %1981 = vtanh.f32 %v1583_v54 }
0x15cd   :  { %v1982_v51 = vpop.eup %1981 }
0x15ce   :  { %1586 = vrot.lane.b32.xlu0 %v1982_v51, %s2022_s30 }
0x15dd   :  { %v1645_v10 = vpop.permute.xlu0 %1644 }
0x15de   :  { %v1647_v11 = vadd.f32 %v1645_v10, %v1637_v9 }
0x15e0   :  { %1983 = vtanh.f32 %v1647_v11 }
0x15e6   :  { %v1984_v12 = vpop.eup %1983 }
0x15e7   :  { %1650 = vrot.lane.b32.xlu2 %v1984_v12, %s2022_s30 }
0x1640   :  { %v1587_v13 = vpop.permute.xlu0 %1586 }
0x1641   :  { %v1651_v16 = vpop.permute.xlu2 %1650  ;;  %v1589_v18 = vmul.f32 %v1587_v13, %v1570_v7 }
0x1642   :  { %v1653_v28 = vmul.f32 %v1651_v16, %v1631_v43 }
0x1643   :  { %1655 = vrot.lane.b32.xlu1 %v1589_v18, %s2023_s6 }
0x1644   :  { %v1680_v15 = vrot.slane %v1653_v28, 7 }
0x1646   :  { %1681 = vrot.lane.b32.xlu2 %v1680_v15, %s2023_s6 }
0x16a0   :  { %v1682_v30 = vpop.permute.xlu2 %1681 }
0x16a1   :  { %1857 = vmatmul.msk.f32.vlgmr.msrb.gmra.mxu3 %vm255_vm1, %v1682_v30 }
0x16b5   :  { %v1656_v29 = vpop.permute.xlu1 %1655 }
0x16b6   :  { %1856 = vmatmul.msk.f32.vlgmr.msra.gmra.mxu2 %vm255_vm1, %v1656_v29 }
0x1724   :  { %v1702_v31 = vpop.f32.mrf.mxu3 }
0x1739   :  { %v1676_v32 = vpop.f32.mrf.mxu2 }
0x173a   :  { %v1703_v14 = vadd.f32 %v1702_v31, %v1676_v32 }
0x173c   :  { %v1705_v55 = vadd.f32 %v1703_v14, %v2431_v49 }
0x173e   :  { %1985 = vtanh.f32 %v1705_v55  ;;  %v1858_v56 = vmul.f32 -1.442695, %v1705_v55 }
0x1740   :  { %1987 = vpow2.f32 %v1858_v56 }
0x1744   :  { %v1986_v46 = vpop.eup %1985 }
0x1745   :  { %1728 = vrot.lane.b32.xlu0 %v1986_v46, %s2022_s30 }
0x1746   :  { %v1988_v58 = vpop.eup %1987 }
0x1747   :  { %v1709_v27 = vadd.f32 1.0, %v1988_v58 }
0x1749   :  { %1989 = vrcp.f32 %v1709_v27  ;;  %v1721_v53 = vand.u32 2147483648, %v1709_v27  ;;  %vm1715_vm6 = vweird.f32 %v1709_v27  ;;  %v1719_v62 = vand.u32 2147483647, %v1709_v27 }
0x174b   :  { %v1722_v48 = vor.u32 1.1754944e-38, %v1721_v53  ;;  %vm1720_vm8 = vcmp.eq.f32.partialorder %v1719_v62, 8.507059e+37 }
0x174f   :  { %v1990_v17 = vpop.eup %1989 }
0x1750   :  { %v1711_v59 = vmul.f32 %v1990_v17, %v1709_v27  ;;  %vm1716_vm5 = vweird.f32 %v1990_v17 }
0x1751   :  { %vm1717_vm7 = vmor %vm1715_vm6, %vm1716_vm5 }
0x1752   :  { %v1712_v60 = vsub.f32 1.0, %v1711_v59 }
0x1754   :  { %v1713_v61 = vmul.f32 %v1990_v17, %v1712_v60 }
0x1756   :  { %v1714_v45 = vadd.f32 %v1990_v17, %v1713_v61 }
0x1758   :  { %v1718_v49 = vsel %vm1717_vm7, %v1990_v17, %v1714_v45 }
0x1759   :  { %v1723_v0 = vsel %vm1720_vm8, %v1722_v48, %v1718_v49 }
0x175a   :  { %v1726_v2 = vmul.f32 %v1723_v0, %v1583_v54 }
0x17b7   :  { %v1729_v63 = vpop.permute.xlu0 %1728 }
0x17b8   :  { %v1731_v1 = vmul.f32 %v1729_v63, %v1723_v0 }
0x17ba   :  { %1733 = vrot.lane.b32.xlu1 %v1731_v1, %s2023_s6 }
0x182c   :  { %v1734_v57 = vpop.permute.xlu1 %1733 }
0x182d   :  { %v1736_v3 = vadd.f32 %v1734_v57, %v1726_v2 }
0x182f   :  { %1991 = vtanh.f32 %v1736_v3 }
0x1835   :  { %v1992_v19 = vpop.eup %1991 }
0x1836   :  { %1739 = vrot.lane.b32.xlu2 %v1992_v19, %s2022_s30  ;;  %s2024_s30 = smov [#allocation2]  }
0x1837   :  { %s1776_s7 = sshll.u32 %s2024_s30, 4  ;;  %s1777_s7 = int_to_ptr.vmem [resolvable:$true] %s1776_s7 }
0x1890   :  { %v1740_v4 = vpop.permute.xlu2 %1739 }
0x1891   :  { %v1742_v24 = vmul.f32 %v1740_v4, %v1723_v0 }
0x1893   :  { %1744 = vrot.lane.b32.xlu0 %v1742_v24, %s2023_s6 }
0x1905   :  { %v1745_v5 = vpop.permute.xlu0 %1744 }
0x1906   :  { %1859 = vmatmul.msk.f32.vlgmr.msrb.gmra.mxu0 %vm255_vm1, %v1745_v5 }
0x1983   :  { %v1767_v6 = vpop.f32.mrf.mxu0 }
0x1984   :  { %v1768_v7 = vadd.f32 %v1767_v6, %v1746_v26 }
0x1986   :  { %1770 = vst [vmem:[#allocation2] sm:$0x1] %v1768_v7 }
0x1987   :  { %1781 = dma.vmem_to_hbm [thread:$0]  %s1777_s7, 16, %s1779_s3, [#allocation3]  }
0x1988   :  { %2018 = dma.done.wait [#allocation3], 16  }
0x1989   :  { %2019 = vsyncadd [#allocation3], 4294967280 }
0x198a   :  { %1786 = vsyncpa [#allocation3], 1 }

</bundles_post_ra>
